<compile_context>
chip_gen: v6e
topology: v6e:2x2x1
jax: 0.10.0
libtpu: 0.0.40
codegen_flags: <defaults>
</compile_context>

<pallas_src>
import jax
import jax.numpy as jnp
from jax.experimental import pallas as pl
from jax.experimental.pallas import tpu as pltpu

D_IN = 600
D_HID = 600
D_OUT = 1

LANE = 128
SUBLANE = 8
D_PAD = 640  # 600 rounded up to 5 * 128


def _round_up(x, m):
    return (x + m - 1) // m * m


def mlp_kernel(x_ref, w1_ref, b1_ref, w2_ref, b2_ref, w3_ref, b3_ref, o_ref):
    """fc1 -> relu -> fc2 -> tanh -> fc3 on one (tb, D_PAD) batch tile.

    x/w1/w2 are bf16 (MXU-native), accumulation and elementwise math are f32.
    fc3 (N=1) is computed as w3_rows @ h2^T so the result is a lane-dense
    (1, tb) row (batch in the lane dimension).
    """
    # fc1 + ReLU  (MXU bf16 x bf16 -> f32; bias/ReLU on VPU in f32)
    h1 = jnp.dot(x_ref[...], w1_ref[...], preferred_element_type=jnp.float32)
    h1 = jnp.maximum(h1 + b1_ref[...], 0.0)

    # fc2 + tanh  (cast activations to bf16 only at the MXU input)
    h2 = jnp.dot(h1.astype(jnp.bfloat16), w2_ref[...],
                 preferred_element_type=jnp.float32)
    h2 = jnp.tanh(h2 + b2_ref[...])

    # fc3: (8, D_PAD) @ (tb, D_PAD)^T -> (8, tb); only row 0 of w3 is real,
    # rows 1..7 are zero padding for sublane alignment.
    y = jnp.einsum("od,td->ot", w3_ref[...], h2,
                   preferred_element_type=jnp.float32)
    o_ref[0] = y[0:1, :] + b3_ref[...]          # o_ref block is (1, 1, tb)


def net_forward(x, w1, b1, w2, b2, w3, b3, *, tb=256):
    """x: (B, 600) f32. Weights stored transposed: w_i is (in, out), b_i (1, out).

    Returns (B, 1) f32, matching PyTorch Net.forward.  Use tb=128 on v5e; for
    best v7x throughput pick tb so that B/tb >= 2 (both TensorCores engaged).
    """
    B = x.shape[0]
    f32, bf16 = jnp.float32, jnp.bfloat16

    # Cap the tile for tiny batches (keep it a multiple of 8 sublanes), then
    # zero-pad the batch up to a tile multiple.
    tb = min(tb, _round_up(B, SUBLANE))
    B_pad = _round_up(B, tb)
    num_tiles = B_pad // tb

    # One-time wrapper-side padding / casting (exact: padded entries are zero).
    xp = jnp.zeros((B_pad, D_PAD), bf16).at[:B, :D_IN].set(x.astype(bf16))
    w1p = jnp.zeros((D_PAD, D_PAD), bf16).at[:D_IN, :D_HID].set(w1.astype(bf16))
    w2p = jnp.zeros((D_PAD, D_PAD), bf16).at[:D_HID, :D_HID].set(w2.astype(bf16))
    b1p = jnp.zeros((1, D_PAD), f32).at[:, :D_HID].set(b1.astype(f32))
    b2p = jnp.zeros((1, D_PAD), f32).at[:, :D_HID].set(b2.astype(f32))
    w3p = jnp.zeros((SUBLANE, D_PAD), f32).at[0, :D_HID].set(
        w3.reshape(D_HID).astype(f32))
    b3p = b3.reshape(1, D_OUT).astype(f32)

    full = lambda shape: pl.BlockSpec(shape, lambda i: (0,) * len(shape))

    out = pl.pallas_call(
        mlp_kernel,
        out_shape=jax.ShapeDtypeStruct((num_tiles, 1, tb), f32),
        grid_spec=pltpu.PrefetchScalarGridSpec(
            num_scalar_prefetch=0,
            grid=(num_tiles,),
            in_specs=[
                pl.BlockSpec((tb, D_PAD), lambda i: (i, 0)),   # x tile (bf16)
                full((D_PAD, D_PAD)),                          # w1 (bf16)
                full((1, D_PAD)),                              # b1 (f32)
                full((D_PAD, D_PAD)),                          # w2 (bf16)
                full((1, D_PAD)),                              # b2 (f32)
                full((SUBLANE, D_PAD)),                        # w3 rows (f32)
                full((1, D_OUT)),                              # b3 (f32)
            ],
            out_specs=pl.BlockSpec((1, 1, tb), lambda i: (i, 0, 0)),
        ),
        compiler_params=pltpu.CompilerParams(
            dimension_semantics=("parallel",),
            vmem_limit_bytes=32 * 1024 * 1024,
        ),
    )(xp, w1p, b1p, w2p, b2p, w3p, b3p)

    # (num_tiles, 1, tb) -> (B, 1), dropping batch padding.
    return out.reshape(B_pad, 1)[:B]


def init_params(key):
    """Deterministic init matching PyTorch Linear shapes (stored transposed)."""
    k1, k2, k3, k4, k5, k6 = jax.random.split(key, 6)
    s1 = 1.0 / jnp.sqrt(D_IN)
    s3 = 1.0 / jnp.sqrt(D_HID)
    w1 = jax.random.uniform(k1, (D_IN, D_HID), jnp.float32, -s1, s1)
    b1 = jax.random.uniform(k2, (1, D_HID), jnp.float32, -s1, s1)
    w2 = jax.random.uniform(k3, (D_HID, D_HID), jnp.float32, -s1, s1)
    b2 = jax.random.uniform(k4, (1, D_HID), jnp.float32, -s1, s1)
    w3 = jax.random.uniform(k5, (D_HID, D_OUT), jnp.float32, -s3, s3)
    b3 = jax.random.uniform(k6, (1, D_OUT), jnp.float32, -s3, s3)
    return w1, b1, w2, b2, w3, b3


def reference_forward(x, w1, b1, w2, b2, w3, b3):
    """Pure-f32 reference (HIGHEST precision dots)."""
    hi = jax.lax.Precision.HIGHEST
    h = jnp.maximum(jnp.dot(x, w1, precision=hi) + b1, 0.0)
    h = jnp.tanh(jnp.dot(h, w2, precision=hi) + b2)
    return jnp.dot(h, w3, precision=hi) + b3


if __name__ == "__main__":
    key = jax.random.PRNGKey(0)
    kx, kp = jax.random.split(key)
    params = init_params(kp)

    # (B, tb) pairs: single-tile default path, and a ragged multi-tile path
    # that exercises batch padding.
    for B, tile in ((8, 256), (20, 8)):
        x = jax.random.normal(jax.random.fold_in(kx, B), (B, D_IN), jnp.float32)
        out = jax.block_until_ready(net_forward(x, *params, tb=tile))
        ref = reference_forward(x, *params)
        assert out.shape == (B, D_OUT)
        # bf16 matmul inputs (f32 accumulate) => ~1e-3-level deviation vs f32.
        assert jnp.allclose(out, ref, atol=3e-2, rtol=3e-2), (
            f"mismatch vs f32 reference at B={B}: "
            f"max abs err {jnp.max(jnp.abs(out - ref))}")

    print("KERNEL_OK")
</pallas_src>

<mosaic_0001>
module attributes {stable_mosaic.version = 11 : i64} {
  func.func @mlp_kernel(%arg0: i32, %arg1: memref<8x640xbf16, #tpu.memory_space<vmem>>, %arg2: memref<640x640xbf16, #tpu.memory_space<vmem>>, %arg3: memref<1x640xf32, #tpu.memory_space<vmem>>, %arg4: memref<640x640xbf16, #tpu.memory_space<vmem>>, %arg5: memref<1x640xf32, #tpu.memory_space<vmem>>, %arg6: memref<8x640xf32, #tpu.memory_space<vmem>>, %arg7: memref<1x1xf32, #tpu.memory_space<vmem>>, %arg8: memref<1x1x8xf32, #tpu.memory_space<vmem>>) attributes {dimension_semantics = [#tpu.dimension_semantics<parallel>], iteration_bounds = array<i64: 1>, scalar_prefetch = 0 : i64, scratch_operands = 0 : i64, tpu.core_type = #tpu.core_type<tc>, window_params = [{transform_indices = @transform_0, window_bounds = array<i64: 8, 640>}, {pipeline_mode = #tpu.pipeline_mode<synchronous>, transform_indices = @transform_1, window_bounds = array<i64: 640, 640>}, {pipeline_mode = #tpu.pipeline_mode<synchronous>, transform_indices = @transform_2, window_bounds = array<i64: 1, 640>}, {pipeline_mode = #tpu.pipeline_mode<synchronous>, transform_indices = @transform_3, window_bounds = array<i64: 640, 640>}, {pipeline_mode = #tpu.pipeline_mode<synchronous>, transform_indices = @transform_4, window_bounds = array<i64: 1, 640>}, {pipeline_mode = #tpu.pipeline_mode<synchronous>, transform_indices = @transform_5, window_bounds = array<i64: 8, 640>}, {pipeline_mode = #tpu.pipeline_mode<synchronous>, transform_indices = @transform_6, window_bounds = array<i64: 1, 1>}, {transform_indices = @transform_7, window_bounds = array<i64: 1, 1, 8>}]} {
    %c0 = arith.constant 0 : index
    %c0_0 = arith.constant 0 : index
    %0 = vector.load %arg1[%c0, %c0_0] : memref<8x640xbf16, #tpu.memory_space<vmem>>, vector<8x640xbf16>
    %c0_1 = arith.constant 0 : index
    %c0_2 = arith.constant 0 : index
    %1 = vector.load %arg2[%c0_1, %c0_2] : memref<640x640xbf16, #tpu.memory_space<vmem>>, vector<640x640xbf16>
    %cst = arith.constant dense<0.000000e+00> : vector<8x640xf32>
    %2 = tpu.matmul %0, %1, %cst {dimension_numbers = #tpu.dot_dimension_numbers<[1], [0], [0], [1], [0, 0, 1, 1], [], []>} : vector<8x640xbf16>, vector<640x640xbf16>, vector<8x640xf32> -> vector<8x640xf32>
    %c0_3 = arith.constant 0 : index
    %c0_4 = arith.constant 0 : index
    %3 = vector.load %arg3[%c0_3, %c0_4] : memref<1x640xf32, #tpu.memory_space<vmem>>, vector<1x640xf32>
    %4 = vector.broadcast %3 : vector<1x640xf32> to vector<8x640xf32>
    %5 = arith.addf %2, %4 : vector<8x640xf32>
    %cst_5 = arith.constant 0.000000e+00 : f32
    %6 = vector.broadcast %cst_5 : f32 to vector<8x640xf32>
    %7 = arith.maximumf %5, %6 : vector<8x640xf32>
    %8 = arith.truncf %7 : vector<8x640xf32> to vector<8x640xbf16>
    %c0_6 = arith.constant 0 : index
    %c0_7 = arith.constant 0 : index
    %9 = vector.load %arg4[%c0_6, %c0_7] : memref<640x640xbf16, #tpu.memory_space<vmem>>, vector<640x640xbf16>
    %cst_8 = arith.constant dense<0.000000e+00> : vector<8x640xf32>
    %10 = tpu.matmul %8, %9, %cst_8 {dimension_numbers = #tpu.dot_dimension_numbers<[1], [0], [0], [1], [0, 0, 1, 1], [], []>} : vector<8x640xbf16>, vector<640x640xbf16>, vector<8x640xf32> -> vector<8x640xf32>
    %c0_9 = arith.constant 0 : index
    %c0_10 = arith.constant 0 : index
    %11 = vector.load %arg5[%c0_9, %c0_10] : memref<1x640xf32, #tpu.memory_space<vmem>>, vector<1x640xf32>
    %12 = vector.broadcast %11 : vector<1x640xf32> to vector<8x640xf32>
    %13 = arith.addf %10, %12 : vector<8x640xf32>
    %14 = math.tanh %13 : vector<8x640xf32>
    %c0_11 = arith.constant 0 : index
    %c0_12 = arith.constant 0 : index
    %15 = vector.load %arg6[%c0_11, %c0_12] : memref<8x640xf32, #tpu.memory_space<vmem>>, vector<8x640xf32>
    "tpu.trace_start"() <{level = 10 : i32, message = "od,td->ot"}> : () -> ()
    %cst_13 = arith.constant dense<0.000000e+00> : vector<8x8xf32>
    %16 = tpu.matmul %15, %14, %cst_13 {dimension_numbers = #tpu.dot_dimension_numbers<[1], [1], [0], [0], [0, 0, 1, 0], [], []>} : vector<8x640xf32>, vector<8x640xf32>, vector<8x8xf32> -> vector<8x8xf32>
    "tpu.trace_stop"() : () -> ()
    %17 = vector.extract_strided_slice %16 {offsets = [0, 0], sizes = [1, 8], strides = [1, 1]} : vector<8x8xf32> to vector<1x8xf32>
    %c0_14 = arith.constant 0 : index
    %c0_15 = arith.constant 0 : index
    %18 = vector.load %arg7[%c0_14, %c0_15] : memref<1x1xf32, #tpu.memory_space<vmem>>, vector<1x1xf32>
    %19 = vector.broadcast %18 : vector<1x1xf32> to vector<1x8xf32>
    %20 = arith.addf %17, %19 : vector<1x8xf32>
    %c0_16 = arith.constant 0 : index
    %c0_17 = arith.constant 0 : index
    %c0_18 = arith.constant 0 : index
    %21 = vector.load %arg8[%c0_16, %c0_17, %c0_18] : memref<1x1x8xf32, #tpu.memory_space<vmem>>, vector<1x1x8xf32>
    %22 = vector.shape_cast %21 : vector<1x1x8xf32> to vector<1x8xf32>
    %23 = vector.shape_cast %20 : vector<1x8xf32> to vector<1x1x8xf32>
    tpu.vector_store %arg8[%c0_16, %c0_17, %c0_18], %23 {strides = array<i32>} : memref<1x1x8xf32, #tpu.memory_space<vmem>>, vector<1x1x8xf32>,
    return
  }
  func.func @transform_0(%arg0: i32) -> (i32, i32) {
    %c0_i32 = arith.constant 0 : i32
    %c0_i32_0 = arith.constant 0 : i32
    return %arg0, %c0_i32 : i32, i32
  }
  func.func @transform_1(%arg0: i32) -> (i32, i32) {
    %c0_i32 = arith.constant 0 : i32
    %c0_i32_0 = arith.constant 0 : i32
    %c0_i32_1 = arith.constant 0 : i32
    return %c0_i32, %c0_i32_0 : i32, i32
  }
  func.func @transform_2(%arg0: i32) -> (i32, i32) {
    %c0_i32 = arith.constant 0 : i32
    %c0_i32_0 = arith.constant 0 : i32
    %c0_i32_1 = arith.constant 0 : i32
    return %c0_i32, %c0_i32_0 : i32, i32
  }
  func.func @transform_3(%arg0: i32) -> (i32, i32) {
    %c0_i32 = arith.constant 0 : i32
    %c0_i32_0 = arith.constant 0 : i32
    %c0_i32_1 = arith.constant 0 : i32
    return %c0_i32, %c0_i32_0 : i32, i32
  }
  func.func @transform_4(%arg0: i32) -> (i32, i32) {
    %c0_i32 = arith.constant 0 : i32
    %c0_i32_0 = arith.constant 0 : i32
    %c0_i32_1 = arith.constant 0 : i32
    return %c0_i32, %c0_i32_0 : i32, i32
  }
  func.func @transform_5(%arg0: i32) -> (i32, i32) {
    %c0_i32 = arith.constant 0 : i32
    %c0_i32_0 = arith.constant 0 : i32
    %c0_i32_1 = arith.constant 0 : i32
    return %c0_i32, %c0_i32_0 : i32, i32
  }
  func.func @transform_6(%arg0: i32) -> (i32, i32) {
    %c0_i32 = arith.constant 0 : i32
    %c0_i32_0 = arith.constant 0 : i32
    %c0_i32_1 = arith.constant 0 : i32
    return %c0_i32, %c0_i32_0 : i32, i32
  }
  func.func @transform_7(%arg0: i32) -> (i32, i32, i32) {
    %c0_i32 = arith.constant 0 : i32
    %c0_i32_0 = arith.constant 0 : i32
    %c0_i32_1 = arith.constant 0 : i32
    return %arg0, %c0_i32, %c0_i32_0 : i32, i32, i32
  }
}

</mosaic_0001>

<bundles_post_ra>
// kernel: tpu_custom_call.1
= control target key start
LH: loop header
LB: loop body
LE: loop exit
PB: predicated region body
PF: predicated region fallthrough
CT: control target
= control target key end

     0   :  { %s5196_s0 = inlined_call_operand.hbm [shape: bf16[8,640], index: 0, kind: input, shape index: {}]   ;;  %s5197_s1 = inlined_call_operand.hbm [shape: bf16[640,640], index: 1, kind: input, shape index: {}]   ;;  %s5198_s2 = inlined_call_operand.vmem [shape: f32[1,640], index: 2, kind: input, shape index: {}]   ;;  %s5199_s3 = inlined_call_operand.hbm [shape: bf16[640,640], index: 3, kind: input, shape index: {}]   ;;  %s5200_s4 = inlined_call_operand.hbm [shape: f32[1,640], index: 4, kind: input, shape index: {}]   ;;  %s5201_s5 = inlined_call_operand.hbm [shape: f32[8,640], index: 5, kind: input, shape index: {}]   ;;  %s5202_s6 = inlined_call_operand.<no memory space> [shape: f32[1,1], index: 6, kind: input, shape index: {}]   ;;  %s5203_s7 = inlined_call_operand.hbm [shape: f32[1,1,8], index: 7, kind: output, shape index: {}]  }
   0x1   :  { %v12_v0 = vstv %s5202_s6 }
   0x2   :  { %13 = vst [vmem:[#allocation2] sm:$0x1] %v12_v0 }
   0x3   :  { %14 = vsyncpa [#allocation4], 0 }
   0x4   :  { %15 = vsyncpa [#allocation7], 0 }
   0x5   :  { %16 = vsyncpa [#allocation10], 0 }
   0x6   :  { %17 = vsyncpa [#allocation5], 0  ;;  %s4993_s26 = smov [#allocation6]  }
   0x7   :  { %s33_s27 = sshll.u32 %s4993_s26, 4  ;;  %s34_s27 = int_to_ptr.vmem [resolvable:$true] %s33_s27 }
   0x8   :  { %s4873_s28 = scalar_lea.vmem %s34_s27, 25600  ;;  %p4878_p1 = scmp.lt.s32.totalorder %s34_s27, %s34_s27 }
   0x9   :  { %p4874_p0 = scmp.ne.s32.totalorder %s34_s27, %s4873_s28  ;;  %p4879_p2 = scmp.lt.s32.totalorder %s4873_s28, %s4873_s28 }
   0xb   :  { %p4880_p3 = por %p4879_p2, %p4878_p1 }
   0xd   :  { %p4881_p4 = pnand %p4880_p3, %p4874_p0 }
   0xf   :  { %4884 = shalt.err (!%p4881_p4)
}
  0x10   :  { %s4994_s29 = smov 320   ;;  %s4995_s30 = smov 20  }
  0x11   :  { %39 = dma.hbm_to_vmem [thread:$0]  %s5197_s1, 25600, %s34_s27, [#allocation7], %s4994_s29, %s4994_s29, %s4995_s30  }
  0x12   :  { %s4996_s9 = smov [#allocation9]   ;;  %s4997_s11 = smov [#allocation3]  }
  0x13   :  { %s60_s10 = sshll.u32 %s4996_s9, 4  ;;  %s24_s12 = sshll.u32 %s4997_s11, 4  ;;  %s61_s10 = int_to_ptr.vmem [resolvable:$true] %s60_s10  ;;  %s25_s12 = int_to_ptr.vmem [resolvable:$true] %s24_s12 }
  0x14   :  { %s4893_s13 = scalar_lea.vmem %s61_s10, 80  ;;  %s4897_s14 = scalar_lea.vmem %s61_s10, 96 }
  0x15   :  { %p4894_p5 = scmp.ne.s32.totalorder %s61_s10, %s4893_s13  ;;  %p4898_p6 = scmp.lt.s32.totalorder %s61_s10, %s61_s10 }
  0x16   :  { %p4899_p7 = scmp.lt.s32.totalorder %s4897_s14, %s4893_s13 }
  0x18   :  { %p4900_p8 = por %p4899_p7, %p4898_p6 }
  0x1a   :  { %p4901_p9 = pnand %p4900_p8, %p4894_p5 }
  0x1c   :  { %4904 = shalt.err (!%p4901_p9)
}
  0x1d   :  { %63 = dma.hbm_to_vmem [thread:$0]  %s5200_s4, 80, %s61_s10, [#allocation10]  }
  0x1e   :  { %s4913_s17 = scalar_lea.vmem %s25_s12, 320  ;;  %p4918_p11 = scmp.lt.s32.totalorder %s25_s12, %s25_s12 }
  0x1f   :  { %p4914_p10 = scmp.ne.s32.totalorder %s25_s12, %s4913_s17  ;;  %p4919_p12 = scmp.lt.s32.totalorder %s4913_s17, %s4913_s17 }
  0x21   :  { %p4920_p13 = por %p4919_p12, %p4918_p11 }
  0x23   :  { %p4921_p0 = pnand %p4920_p13, %p4914_p10 }
  0x25   :  { %4924 = shalt.err (!%p4921_p0)
}
  0x26   :  { %27 = dma.hbm_to_vmem [thread:$0]  %s5196_s0, 320, %s25_s12, [#allocation4]  }
  0x27   :  { %s4998_s19 = smov [#allocation8]   ;;  %s4999_s21 = smov [#allocation11]  }
  0x28   :  { %s47_s20 = sshll.u32 %s4998_s19, 4  ;;  %s70_s22 = sshll.u32 %s4999_s21, 4  ;;  %s48_s20 = int_to_ptr.vmem [resolvable:$true] %s47_s20  ;;  %s71_s22 = int_to_ptr.vmem [resolvable:$true] %s70_s22 }
  0x29   :  { %s4933_s23 = scalar_lea.vmem %s48_s20, 25600  ;;  %p4938_p2 = scmp.lt.s32.totalorder %s48_s20, %s48_s20 }
  0x2a   :  { %p4934_p1 = scmp.ne.s32.totalorder %s48_s20, %s4933_s23  ;;  %p4939_p3 = scmp.lt.s32.totalorder %s4933_s23, %s4933_s23 }
  0x2c   :  { %p4940_p4 = por %p4939_p3, %p4938_p2 }
  0x2e   :  { %p4941_p5 = pnand %p4940_p4, %p4934_p1 }
  0x30   :  { %4944 = shalt.err (!%p4941_p5)
}
  0x31   :  { %53 = dma.hbm_to_vmem [thread:$0]  %s5199_s3, 25600, %s48_s20, [#allocation7], %s4994_s29, %s4994_s29, %s4995_s30  }
  0x32   :  { %s4953_s0 = scalar_lea.vmem %s71_s22, 640  ;;  %p4958_p7 = scmp.lt.s32.totalorder %s71_s22, %s71_s22 }
  0x33   :  { %p4954_p6 = scmp.ne.s32.totalorder %s71_s22, %s4953_s0  ;;  %p4959_p8 = scmp.lt.s32.totalorder %s4953_s0, %s4953_s0 }
  0x35   :  { %p4960_p9 = por %p4959_p8, %p4958_p7 }
  0x37   :  { %p4961_p10 = pnand %p4960_p9, %p4954_p6 }
  0x39   :  { %4964 = shalt.err (!%p4961_p10)
}
  0x3a   :  { %73 = dma.hbm_to_vmem [thread:$0]  %s5201_s5, 640, %s71_s22, [#allocation10]  }
  0x3b   :  { %4985 = dma.done.wait [#allocation4], 320  }
  0x3c   :  { %4986 = vsyncadd [#allocation4], 4294966976 }
  0x3d   :  { %4987 = dma.done.wait [#allocation7], 51200  }
  0x3e   :  { %4988 = vsyncadd [#allocation7], 4294916096 }
  0x3f   :  { %4989 = dma.done.wait [#allocation10], 720  }
  0x40   :  { %4990 = vsyncadd [#allocation10], 4294966576  ;;  %v5000_v1 = vmov 0   ;;  %v4289_v2 = vld [vmem:[#allocation6 + $0x11c] ss:$20 sps:$4 sm:$0xff]   ;;  %v93_v52 = vld [vmem:[#allocation3 + $0x8] sm:$0xff] }
  0x41   :  { %4288 = vset.pattern.permute.xlu0 %v5000_v1  ;;  %v4291_v3 = vld [vmem:[#allocation6 + $0x118] ss:$20 sps:$4 sm:$0xff]   ;;  %1420 = vmatprep.subr.bf16.mxu0 %v4289_v2  ;;  %v4292_v4 = vld [vmem:[#allocation6 + $0x39c] ss:$20 sps:$4 sm:$0xff]   ;;  %v4295_v6 = vld [vmem:[#allocation6 + $0xf4] ss:$20 sps:$4 sm:$0xff]   ;;  %v5072_v54 = vcombine.high %v93_v52, %v93_v52 }
  0x42   :  { %v4294_v5 = vld [vmem:[#allocation6 + $0x398] ss:$20 sps:$4 sm:$0xff]   ;;  %1421 = vmatpush1.bf16.msra.mxu0 %v4291_v3  ;;  %v4297_v7 = vld [vmem:[#allocation6 + $0xf0] ss:$20 sps:$4 sm:$0xff]   ;;  %1461 = vmatprep.subr.bf16.mxu1 %v4292_v4  ;;  %v4298_v8 = vld [vmem:[#allocation6 + $0x374] ss:$20 sps:$4 sm:$0xff]  }
  0x43   :  { %1462 = vmatpush1.bf16.msra.mxu1 %v4294_v5  ;;  %1422 = vmatprep.subr.bf16.mxu0 %v4295_v6  ;;  %v4300_v9 = vld [vmem:[#allocation6 + $0x370] ss:$20 sps:$4 sm:$0xff]   ;;  %v4301_v10 = vld [vmem:[#allocation6 + $0xcc] ss:$20 sps:$4 sm:$0xff]   ;;  %v4303_v11 = vld [vmem:[#allocation6 + $0xc8] ss:$20 sps:$4 sm:$0xff]  }
  0x44   :  { %1463 = vmatprep.subr.bf16.mxu1 %v4298_v8  ;;  %v4304_v12 = vld [vmem:[#allocation6 + $0x34c] ss:$20 sps:$4 sm:$0xff]   ;;  %v4307_v13 = vld [vmem:[#allocation6 + $0xa4] ss:$20 sps:$4 sm:$0xff]   ;;  %v4306_v14 = vld [vmem:[#allocation6 + $0x348] ss:$20 sps:$4 sm:$0xff]   ;;  %1493 = vmatprep.mubr.bf16.mxu1 %v5072_v54 }
  0x45   :  { %v4310_v15 = vld [vmem:[#allocation6 + $0x324] ss:$20 sps:$4 sm:$0xff]   ;;  %v4309_v16 = vld [vmem:[#allocation6 + $0xa0] ss:$20 sps:$4 sm:$0xff]   ;;  %v4313_v17 = vld [vmem:[#allocation6 + $0x7c] ss:$20 sps:$4 sm:$0xff]  }
  0x46   :  { %1423 = vmatpush1.bf16.msra.mxu0 %v4297_v7  ;;  %v4312_v18 = vld [vmem:[#allocation6 + $0x320] ss:$20 sps:$4 sm:$0xff]   ;;  %v4316_v19 = vld [vmem:[#allocation6 + $0x2fc] ss:$20 sps:$4 sm:$0xff]   ;;  %v4315_v20 = vld [vmem:[#allocation6 + $0x78] ss:$20 sps:$4 sm:$0xff]  }
  0x47   :  { %1424 = vmatprep.subr.bf16.mxu0 %v4301_v10  ;;  %1464 = vmatpush1.bf16.msra.mxu1 %v4300_v9  ;;  %v4319_v21 = vld [vmem:[#allocation6 + $0x54] ss:$20 sps:$4 sm:$0xff]   ;;  %v4318_v22 = vld [vmem:[#allocation6 + $0x2f8] ss:$20 sps:$4 sm:$0xff]   ;;  %v4321_v24 = vld [vmem:[#allocation6 + $0x50] ss:$20 sps:$4 sm:$0xff]  }
  0x48   :  { %1465 = vmatprep.subr.bf16.mxu1 %v4304_v12  ;;  %v4322_v23 = vld [vmem:[#allocation6 + $0x2d4] ss:$20 sps:$4 sm:$0xff]   ;;  %v4325_v25 = vld [vmem:[#allocation6 + $0x2c] ss:$20 sps:$4 sm:$0xff]   ;;  %v4324_v26 = vld [vmem:[#allocation6 + $0x2d0] ss:$20 sps:$4 sm:$0xff]  }
  0x49   :  { %v4328_v27 = vld [vmem:[#allocation6 + $0x2ac] ss:$20 sps:$4 sm:$0xff]   ;;  %v4327_v28 = vld [vmem:[#allocation6 + $0x28] ss:$20 sps:$4 sm:$0xff]   ;;  %v4331_v29 = vld [vmem:[#allocation6 + $0x4] ss:$20 sps:$4 sm:$0xff]  }
  0x4a   :  { %1425 = vmatpush1.bf16.msra.mxu0 %v4303_v11  ;;  %v4330_v30 = vld [vmem:[#allocation6 + $0x2a8] ss:$20 sps:$4 sm:$0xff]   ;;  %v4334_v31 = vld [vmem:[#allocation6 + $0x284] ss:$20 sps:$4 sm:$0xff]   ;;  %v4333_v32 = vld [vmem:[#allocation6] ss:$20 sps:$4 sm:$0xff]   ;;  %v5077_v11 = vcombine.low %v93_v52, %v93_v52 }
  0x4b   :  { %1426 = vmatprep.subr.bf16.mxu0 %v4307_v13  ;;  %1466 = vmatpush1.bf16.msra.mxu1 %v4306_v14  ;;  %v4337_v33 = vld [vmem:[#allocation6 + $0x25c] ss:$20 sps:$4 sm:$0xff]   ;;  %v4336_v34 = vld [vmem:[#allocation6 + $0x280] ss:$20 sps:$4 sm:$0xff]   ;;  %v4339_v36 = vld [vmem:[#allocation6 + $0x258] ss:$20 sps:$4 sm:$0xff]  }
  0x4c   :  { %1467 = vmatprep.subr.bf16.mxu1 %v4310_v15  ;;  %v4340_v35 = vld [vmem:[#allocation6 + $0x4dc] ss:$20 sps:$4 sm:$0xff]   ;;  %v4343_v37 = vld [vmem:[#allocation6 + $0x234] ss:$20 sps:$4 sm:$0xff]   ;;  %v4342_v38 = vld [vmem:[#allocation6 + $0x4d8] ss:$20 sps:$4 sm:$0xff]  }
  0x4d   :  { %v4346_v39 = vld [vmem:[#allocation6 + $0x4b4] ss:$20 sps:$4 sm:$0xff]   ;;  %v4345_v40 = vld [vmem:[#allocation6 + $0x230] ss:$20 sps:$4 sm:$0xff]   ;;  %v4349_v41 = vld [vmem:[#allocation6 + $0x20c] ss:$20 sps:$4 sm:$0xff]  }
  0x4e   :  { %1427 = vmatpush1.bf16.msra.mxu0 %v4309_v16  ;;  %v4348_v42 = vld [vmem:[#allocation6 + $0x4b0] ss:$20 sps:$4 sm:$0xff]   ;;  %v4352_v43 = vld [vmem:[#allocation6 + $0x48c] ss:$20 sps:$4 sm:$0xff]   ;;  %v4351_v44 = vld [vmem:[#allocation6 + $0x208] ss:$20 sps:$4 sm:$0xff]  }
  0x4f   :  { %1428 = vmatprep.subr.bf16.mxu0 %v4313_v17  ;;  %1468 = vmatpush1.bf16.msra.mxu1 %v4312_v18  ;;  %v4355_v45 = vld [vmem:[#allocation6 + $0x1e4] ss:$20 sps:$4 sm:$0xff]   ;;  %v4354_v46 = vld [vmem:[#allocation6 + $0x488] ss:$20 sps:$4 sm:$0xff]   ;;  %v92_v48 = vld [vmem:[#allocation3] sm:$0xff]  ;;  %vm5002_vm0 = vmmov 0  }
  0x50   :  { %1469 = vmatprep.subr.bf16.mxu1 %v4316_v19  ;;  %v4358_v47 = vld [vmem:[#allocation6 + $0x464] ss:$20 sps:$4 sm:$0xff]   ;;  %v4357_v49 = vld [vmem:[#allocation6 + $0x1e0] ss:$20 sps:$4 sm:$0xff]   ;;  %v5069_v50 = vcombine.high %v92_v48, %v92_v48  ;;  %v4361_v51 = vld [vmem:[#allocation6 + $0x1bc] ss:$20 sps:$4 sm:$0xff]   ;;  %v5075_v8 = vcombine.low %v92_v48, %v92_v48 }
  0x51   :  { %v4360_v53 = vld [vmem:[#allocation6 + $0x460] ss:$20 sps:$4 sm:$0xff]   ;;  %v4364_v55 = vld [vmem:[#allocation6 + $0x43c] ss:$20 sps:$4 sm:$0xff]   ;;  %v4363_v56 = vld [vmem:[#allocation6 + $0x1b8] ss:$20 sps:$4 sm:$0xff]  }
  0x52   :  { %1429 = vmatpush1.bf16.msra.mxu0 %v4315_v20  ;;  %1452 = vmatprep.mubr.bf16.mxu0 %v5069_v50  ;;  %v4367_v57 = vld [vmem:[#allocation6 + $0x194] ss:$20 sps:$4 sm:$0xff]   ;;  %v4366_v58 = vld [vmem:[#allocation6 + $0x438] ss:$20 sps:$4 sm:$0xff]   ;;  %v4369_v60 = vld [vmem:[#allocation6 + $0x190] ss:$20 sps:$4 sm:$0xff]  }
  0x53   :  { %1430 = vmatprep.subr.bf16.mxu0 %v4319_v21  ;;  %1470 = vmatpush1.bf16.msra.mxu1 %v4318_v22  ;;  %v4370_v59 = vld [vmem:[#allocation6 + $0x414] ss:$20 sps:$4 sm:$0xff]   ;;  %v4373_v61 = vld [vmem:[#allocation6 + $0x16c] ss:$20 sps:$4 sm:$0xff]   ;;  %v4372_v62 = vld [vmem:[#allocation6 + $0x410] ss:$20 sps:$4 sm:$0xff]  }
  0x54   :  { %1471 = vmatprep.subr.bf16.mxu1 %v4322_v23  ;;  %v4376_v63 = vld [vmem:[#allocation6 + $0x3ec] ss:$20 sps:$4 sm:$0xff]   ;;  %v4375_v0 = vld [vmem:[#allocation6 + $0x168] ss:$20 sps:$4 sm:$0xff]   ;;  %v4379_v2 = vld [vmem:[#allocation6 + $0x144] ss:$20 sps:$4 sm:$0xff]  }
  0x55   :  { %v4378_v3 = vld [vmem:[#allocation6 + $0x3e8] ss:$20 sps:$4 sm:$0xff]   ;;  %v4382_v4 = vld [vmem:[#allocation6 + $0x3c4] ss:$20 sps:$4 sm:$0xff]   ;;  %v4381_v5 = vld [vmem:[#allocation6 + $0x140] ss:$20 sps:$4 sm:$0xff]  }
  0x56   :  { %1431 = vmatpush1.bf16.msra.mxu0 %v4321_v24  ;;  %v4389_v6 = vld [vmem:[#allocation6 + $0x61c] ss:$20 sps:$4 sm:$0xff]   ;;  %v4385_v7 = vld [vmem:[#allocation6 + $0x3c0] ss:$20 sps:$4 sm:$0xff]   ;;  %v4394_v9 = vld [vmem:[#allocation6 + $0x124] ss:$20 sps:$4 sm:$0xff]  }
  0x57   :  { %1432 = vmatprep.subr.bf16.mxu0 %v4325_v25  ;;  %1472 = vmatpush1.bf16.msra.mxu1 %v4324_v26  ;;  %v4387_v10 = vld [vmem:[#allocation6 + $0x618] ss:$20 sps:$4 sm:$0xff]   ;;  %v4397_v12 = vld [vmem:[#allocation6 + $0x5f4] ss:$20 sps:$4 sm:$0xff]   ;;  %v4400_v14 = vld [vmem:[#allocation6 + $0xfc] ss:$20 sps:$4 sm:$0xff]  }
  0x58   :  { %1473 = vmatprep.subr.bf16.mxu1 %v4328_v27  ;;  %v4392_v13 = vld [vmem:[#allocation6 + $0x120] ss:$20 sps:$4 sm:$0xff]   ;;  %v4395_v15 = vld [vmem:[#allocation6 + $0x5f0] ss:$20 sps:$4 sm:$0xff]   ;;  %v4398_v17 = vld [vmem:[#allocation6 + $0xf8] ss:$20 sps:$4 sm:$0xff]  }
  0x59   :  { %v4403_v16 = vld [vmem:[#allocation6 + $0x5cc] ss:$20 sps:$4 sm:$0xff]   ;;  %v4406_v18 = vld [vmem:[#allocation6 + $0xd4] ss:$20 sps:$4 sm:$0xff]   ;;  %v4409_v20 = vld [vmem:[#allocation6 + $0x5a4] ss:$20 sps:$4 sm:$0xff]  }
  0x5a   :  { %1433 = vmatpush1.bf16.msra.mxu0 %v4327_v28  ;;  %v4401_v19 = vld [vmem:[#allocation6 + $0x5c8] ss:$20 sps:$4 sm:$0xff]   ;;  %v4404_v21 = vld [vmem:[#allocation6 + $0xd0] ss:$20 sps:$4 sm:$0xff]   ;;  %v4412_v22 = vld [vmem:[#allocation6 + $0xac] ss:$20 sps:$4 sm:$0xff]  }
  0x5b   :  { %1434 = vmatprep.subr.bf16.mxu0 %v4331_v29  ;;  %1474 = vmatpush1.bf16.msra.mxu1 %v4330_v30  ;;  %v4407_v23 = vld [vmem:[#allocation6 + $0x5a0] ss:$20 sps:$4 sm:$0xff]   ;;  %v4415_v24 = vld [vmem:[#allocation6 + $0x57c] ss:$20 sps:$4 sm:$0xff]   ;;  %v4418_v26 = vld [vmem:[#allocation6 + $0x84] ss:$20 sps:$4 sm:$0xff]  }
  0x5c   :  { %1475 = vmatprep.subr.bf16.mxu1 %v4334_v31  ;;  %v4410_v25 = vld [vmem:[#allocation6 + $0xa8] ss:$20 sps:$4 sm:$0xff]   ;;  %v4413_v27 = vld [vmem:[#allocation6 + $0x578] ss:$20 sps:$4 sm:$0xff]   ;;  %v4416_v29 = vld [vmem:[#allocation6 + $0x80] ss:$20 sps:$4 sm:$0xff]  }
  0x5d   :  { %v4421_v28 = vld [vmem:[#allocation6 + $0x554] ss:$20 sps:$4 sm:$0xff]   ;;  %v4424_v30 = vld [vmem:[#allocation6 + $0x5c] ss:$20 sps:$4 sm:$0xff]   ;;  %v4444_v48 = vld [vmem:[#allocation6 + $0x378] ss:$20 sps:$4 sm:$0xff]  }
  0x5e   :  { %1435 = vmatpush1.bf16.msra.mxu0 %v4333_v32  ;;  %v4419_v31 = vld [vmem:[#allocation6 + $0x550] ss:$20 sps:$4 sm:$0xff]   ;;  %v4427_v32 = vld [vmem:[#allocation6 + $0x52c] ss:$20 sps:$4 sm:$0xff]   ;;  %v4455_v52 = vld [vmem:[#allocation6 + $0x214] ss:$20 sps:$4 sm:$0xff]  }
  0x5f   :  { %1436 = vmatprep.subr.bf16.mxu0 %v4337_v33  ;;  %1476 = vmatpush1.bf16.msra.mxu1 %v4336_v34  ;;  %v4422_v33 = vld [vmem:[#allocation6 + $0x58] ss:$20 sps:$4 sm:$0xff]   ;;  %v4430_v34 = vld [vmem:[#allocation6 + $0x34] ss:$20 sps:$4 sm:$0xff]   ;;  %vm3700_vm1 = vcmask 57344  }
  0x60   :  { %1477 = vmatprep.subr.bf16.mxu1 %v4340_v35  ;;  %v4425_v35 = vld [vmem:[#allocation6 + $0x528] ss:$20 sps:$4 sm:$0xff]  }
  0x62   :  { %1437 = vmatpush2.bf16.msra.mxu0 %v4339_v36  ;;  %v4433_v36 = vld [vmem:[#allocation6 + $0x504] ss:$20 sps:$4 sm:$0xff]  }
  0x63   :  { %1438 = vmatprep.subr.bf16.mxu0 %v4343_v37  ;;  %1478 = vmatpush2.bf16.msra.mxu1 %v4342_v38  ;;  %v4428_v37 = vld [vmem:[#allocation6 + $0x30] ss:$20 sps:$4 sm:$0xff]   ;;  %v4436_v38 = vld [vmem:[#allocation6 + $0xc] ss:$20 sps:$4 sm:$0xff]  }
  0x64   :  { %1479 = vmatprep.subr.bf16.mxu1 %v4346_v39  ;;  %v4431_v39 = vld [vmem:[#allocation6 + $0x500] ss:$20 sps:$4 sm:$0xff]  }
  0x66   :  { %1439 = vmatpush2.bf16.msra.mxu0 %v4345_v40  ;;  %v4440_v40 = vld [vmem:[#allocation6 + $0x3a4] ss:$20 sps:$4 sm:$0xff]  }
  0x67   :  { %1440 = vmatprep.subr.bf16.mxu0 %v4349_v41  ;;  %1480 = vmatpush2.bf16.msra.mxu1 %v4348_v42  ;;  %v4434_v41 = vld [vmem:[#allocation6 + $0x8] ss:$20 sps:$4 sm:$0xff]  }
  0x68   :  { %1481 = vmatprep.subr.bf16.mxu1 %v4352_v43  ;;  %v5083_v42 = vld [vmem:[#allocation3 + $0x10] ss:$0 sps:$4 sm:$0xff]   ;;  %v4443_v43 = vld [vmem:[#allocation6 + $0x264] ss:$20 sps:$4 sm:$0xff]  }
  0x6a   :  { %1441 = vmatpush2.bf16.msra.mxu0 %v4351_v44  ;;  %v4438_v44 = vld [vmem:[#allocation6 + $0x3a0] ss:$20 sps:$4 sm:$0xff]  }
  0x6b   :  { %1442 = vmatprep.subr.bf16.mxu0 %v4355_v45  ;;  %1482 = vmatpush2.bf16.msra.mxu1 %v4354_v46  ;;  %v4446_v45 = vld [vmem:[#allocation6 + $0x37c] ss:$20 sps:$4 sm:$0xff]   ;;  %v4441_v46 = vld [vmem:[#allocation6 + $0x260] ss:$20 sps:$4 sm:$0xff]  }
  0x6c   :  { %1483 = vmatprep.subr.bf16.mxu1 %v4358_v47  ;;  %v4449_v47 = vld [vmem:[#allocation6 + $0x23c] ss:$20 sps:$4 sm:$0xff]  }
  0x6e   :  { %1443 = vmatpush2.bf16.msra.mxu0 %v4357_v49  ;;  %v4452_v49 = vld [vmem:[#allocation6 + $0x354] ss:$20 sps:$4 sm:$0xff]  }
  0x6f   :  { %1444 = vmatprep.subr.bf16.mxu0 %v4361_v51  ;;  %1484 = vmatpush2.bf16.msra.mxu1 %v4360_v53  ;;  %v4447_v51 = vld [vmem:[#allocation6 + $0x238] ss:$20 sps:$4 sm:$0xff]   ;;  %v4450_v53 = vld [vmem:[#allocation6 + $0x350] ss:$20 sps:$4 sm:$0xff]  }
  0x70   :  { %1485 = vmatprep.subr.bf16.mxu1 %v4364_v55  ;;  %v4458_v55 = vld [vmem:[#allocation6 + $0x32c] ss:$20 sps:$4 sm:$0xff]  }
  0x72   :  { %1445 = vmatpush2.bf16.msra.mxu0 %v4363_v56  ;;  %v4453_v56 = vld [vmem:[#allocation6 + $0x210] ss:$20 sps:$4 sm:$0xff]  }
  0x73   :  { %1446 = vmatprep.subr.bf16.mxu0 %v4367_v57  ;;  %1486 = vmatpush2.bf16.msra.mxu1 %v4366_v58  ;;  %v4461_v57 = vld [vmem:[#allocation6 + $0x1ec] ss:$20 sps:$4 sm:$0xff]   ;;  %v4456_v58 = vld [vmem:[#allocation6 + $0x328] ss:$20 sps:$4 sm:$0xff]  }
  0x74   :  { %1487 = vmatprep.subr.bf16.mxu1 %v4370_v59  ;;  %v4464_v59 = vld [vmem:[#allocation6 + $0x304] ss:$20 sps:$4 sm:$0xff]  }
  0x76   :  { %1447 = vmatpush2.bf16.msra.mxu0 %v4369_v60  ;;  %v4459_v60 = vld [vmem:[#allocation6 + $0x1e8] ss:$20 sps:$4 sm:$0xff]  }
  0x77   :  { %1448 = vmatprep.subr.bf16.mxu0 %v4373_v61  ;;  %1488 = vmatpush2.bf16.msra.mxu1 %v4372_v62  ;;  %v4467_v61 = vld [vmem:[#allocation6 + $0x1c4] ss:$20 sps:$4 sm:$0xff]   ;;  %v4462_v62 = vld [vmem:[#allocation6 + $0x300] ss:$20 sps:$4 sm:$0xff]  }
  0x78   :  { %1489 = vmatprep.subr.bf16.mxu1 %v4376_v63  ;;  %v4470_v63 = vld [vmem:[#allocation6 + $0x2dc] ss:$20 sps:$4 sm:$0xff]  }
  0x7a   :  { %1449 = vmatpush2.bf16.msra.mxu0 %v4375_v0  ;;  %v4465_v0 = vld [vmem:[#allocation6 + $0x1c0] ss:$20 sps:$4 sm:$0xff]  }
  0x7b   :  { %1450 = vmatprep.subr.bf16.mxu0 %v4379_v2  ;;  %1490 = vmatpush2.bf16.msra.mxu1 %v4378_v3  ;;  %v4473_v2 = vld [vmem:[#allocation6 + $0x19c] ss:$20 sps:$4 sm:$0xff]   ;;  %v4468_v3 = vld [vmem:[#allocation6 + $0x2d8] ss:$20 sps:$4 sm:$0xff]  }
  0x7c   :  { %1491 = vmatprep.subr.bf16.mxu1 %v4382_v4  ;;  %v4476_v4 = vld [vmem:[#allocation6 + $0x2b4] ss:$20 sps:$4 sm:$0xff]  }
  0x7e   :  { %1451 = vmatpush2.bf16.msra.mxu0 %v4381_v5  ;;  %v4471_v5 = vld [vmem:[#allocation6 + $0x198] ss:$20 sps:$4 sm:$0xff]  }
  0x7f   :  { %1502 = vmatprep.subr.bf16.mxu0 %v4389_v6  ;;  %1492 = vmatpush2.bf16.msra.mxu1 %v4385_v7  ;;  %v4479_v6 = vld [vmem:[#allocation6 + $0x174] ss:$20 sps:$4 sm:$0xff]   ;;  %v4474_v7 = vld [vmem:[#allocation6 + $0x2b0] ss:$20 sps:$4 sm:$0xff]  }
  0x80   :  { %1543 = vmatprep.subr.bf16.mxu1 %v4394_v9  ;;  %v4482_v9 = vld [vmem:[#allocation6 + $0x28c] ss:$20 sps:$4 sm:$0xff]  }
  0x81   :  { %1453 = vmatmul.mubr.bf16.vlgmr.msra.gmra.mxu0 %v5075_v8 }
  0x82   :  { %1503 = vmatpush1.bf16.msra.mxu0 %v4387_v10  ;;  %1534 = vmatprep.mubr.bf16.mxu0 %v5000_v1  ;;  %v4477_v10 = vld [vmem:[#allocation6 + $0x170] ss:$20 sps:$4 sm:$0xff]  }
  0x83   :  { %1494 = vmatmul.mubr.bf16.vlgmr.msra.gmra.mxu1 %v5077_v11  ;;  %1504 = vmatprep.subr.bf16.mxu0 %v4397_v12  ;;  %v4485_v12 = vld [vmem:[#allocation6 + $0x14c] ss:$20 sps:$4 sm:$0xff]  }
  0x84   :  { %1544 = vmatpush1.bf16.msra.mxu1 %v4392_v13  ;;  %1575 = vmatprep.mubr.bf16.mxu1 %v5069_v50  ;;  %v4480_v13 = vld [vmem:[#allocation6 + $0x288] ss:$20 sps:$4 sm:$0xff]  }
  0x85   :  { %1545 = vmatprep.subr.bf16.mxu1 %v4400_v14  ;;  %v4488_v14 = vld [vmem:[#allocation6 + $0x4e4] ss:$20 sps:$4 sm:$0xff]  }
  0x86   :  { %1505 = vmatpush1.bf16.msra.mxu0 %v4395_v15  ;;  %v4483_v15 = vld [vmem:[#allocation6 + $0x148] ss:$20 sps:$4 sm:$0xff]  }
  0x87   :  { %1506 = vmatprep.subr.bf16.mxu0 %v4403_v16  ;;  %v4491_v16 = vld [vmem:[#allocation6 + $0x624] ss:$20 sps:$4 sm:$0xff]  }
  0x88   :  { %1546 = vmatpush1.bf16.msra.mxu1 %v4398_v17  ;;  %v4486_v17 = vld [vmem:[#allocation6 + $0x4e0] ss:$20 sps:$4 sm:$0xff]  }
  0x89   :  { %1547 = vmatprep.subr.bf16.mxu1 %v4406_v18  ;;  %v4494_v18 = vld [vmem:[#allocation6 + $0x4bc] ss:$20 sps:$4 sm:$0xff]  }
  0x8a   :  { %1507 = vmatpush1.bf16.msra.mxu0 %v4401_v19  ;;  %v4489_v19 = vld [vmem:[#allocation6 + $0x620] ss:$20 sps:$4 sm:$0xff]  }
  0x8b   :  { %1508 = vmatprep.subr.bf16.mxu0 %v4409_v20  ;;  %v4497_v20 = vld [vmem:[#allocation6 + $0x5fc] ss:$20 sps:$4 sm:$0xff]  }
  0x8c   :  { %1548 = vmatpush1.bf16.msra.mxu1 %v4404_v21  ;;  %v4492_v21 = vld [vmem:[#allocation6 + $0x4b8] ss:$20 sps:$4 sm:$0xff]  }
  0x8d   :  { %1549 = vmatprep.subr.bf16.mxu1 %v4412_v22  ;;  %v4500_v22 = vld [vmem:[#allocation6 + $0x494] ss:$20 sps:$4 sm:$0xff]  }
  0x8e   :  { %1509 = vmatpush1.bf16.msra.mxu0 %v4407_v23  ;;  %v4495_v23 = vld [vmem:[#allocation6 + $0x5f8] ss:$20 sps:$4 sm:$0xff]  }
  0x8f   :  { %1510 = vmatprep.subr.bf16.mxu0 %v4415_v24  ;;  %v4503_v24 = vld [vmem:[#allocation6 + $0x5d4] ss:$20 sps:$4 sm:$0xff]  }
  0x90   :  { %1550 = vmatpush1.bf16.msra.mxu1 %v4410_v25  ;;  %v4498_v25 = vld [vmem:[#allocation6 + $0x490] ss:$20 sps:$4 sm:$0xff]  }
  0x91   :  { %1551 = vmatprep.subr.bf16.mxu1 %v4418_v26  ;;  %v4506_v26 = vld [vmem:[#allocation6 + $0x46c] ss:$20 sps:$4 sm:$0xff]  }
  0x92   :  { %1511 = vmatpush1.bf16.msra.mxu0 %v4413_v27  ;;  %v4501_v27 = vld [vmem:[#allocation6 + $0x5d0] ss:$20 sps:$4 sm:$0xff]  }
  0x93   :  { %1512 = vmatprep.subr.bf16.mxu0 %v4421_v28  ;;  %v4509_v28 = vld [vmem:[#allocation6 + $0x5ac] ss:$20 sps:$4 sm:$0xff]  }
  0x94   :  { %1552 = vmatpush1.bf16.msra.mxu1 %v4416_v29  ;;  %v4504_v29 = vld [vmem:[#allocation6 + $0x468] ss:$20 sps:$4 sm:$0xff]  }
  0x95   :  { %1553 = vmatprep.subr.bf16.mxu1 %v4424_v30  ;;  %v4512_v30 = vld [vmem:[#allocation6 + $0x444] ss:$20 sps:$4 sm:$0xff]  }
  0x96   :  { %1513 = vmatpush1.bf16.msra.mxu0 %v4419_v31  ;;  %v4507_v31 = vld [vmem:[#allocation6 + $0x5a8] ss:$20 sps:$4 sm:$0xff]  }
  0x97   :  { %1514 = vmatprep.subr.bf16.mxu0 %v4427_v32  ;;  %v4515_v32 = vld [vmem:[#allocation6 + $0x584] ss:$20 sps:$4 sm:$0xff]  }
  0x98   :  { %1554 = vmatpush1.bf16.msra.mxu1 %v4422_v33  ;;  %v4510_v33 = vld [vmem:[#allocation6 + $0x440] ss:$20 sps:$4 sm:$0xff]  }
  0x99   :  { %1555 = vmatprep.subr.bf16.mxu1 %v4430_v34  ;;  %v4518_v34 = vld [vmem:[#allocation6 + $0x41c] ss:$20 sps:$4 sm:$0xff]  }
  0x9a   :  { %1515 = vmatpush1.bf16.msra.mxu0 %v4425_v35  ;;  %v4513_v35 = vld [vmem:[#allocation6 + $0x580] ss:$20 sps:$4 sm:$0xff]  }
  0x9b   :  { %1516 = vmatprep.subr.bf16.mxu0 %v4433_v36  ;;  %v4521_v36 = vld [vmem:[#allocation6 + $0x55c] ss:$20 sps:$4 sm:$0xff]  }
  0x9c   :  { %1556 = vmatpush1.bf16.msra.mxu1 %v4428_v37  ;;  %v4516_v37 = vld [vmem:[#allocation6 + $0x418] ss:$20 sps:$4 sm:$0xff]  }
  0x9d   :  { %1557 = vmatprep.subr.bf16.mxu1 %v4436_v38  ;;  %v4524_v38 = vld [vmem:[#allocation6 + $0x3f4] ss:$20 sps:$4 sm:$0xff]  }
  0x9e   :  { %1517 = vmatpush1.bf16.msra.mxu0 %v4431_v39  ;;  %v4519_v39 = vld [vmem:[#allocation6 + $0x558] ss:$20 sps:$4 sm:$0xff]  }
  0x9f   :  { %1584 = vmatprep.subr.bf16.mxu0 %v4440_v40  ;;  %v4527_v40 = vld [vmem:[#allocation6 + $0x534] ss:$20 sps:$4 sm:$0xff]  }
  0xa0   :  { %1558 = vmatpush1.bf16.msra.mxu1 %v4434_v41  ;;  %v4522_v41 = vld [vmem:[#allocation6 + $0x3f0] ss:$20 sps:$4 sm:$0xff]  }
  0xa1   :  { %1535 = vmatmul.mubr.bf16.vlgmr.msra.gmra.mxu0 %v5083_v42  ;;  %1559 = vmatprep.subr.bf16.mxu1 %v4443_v43  ;;  %v4530_v43 = vld [vmem:[#allocation6 + $0x3cc] ss:$20 sps:$4 sm:$0xff]  }
  0xa2   :  { %1585 = vmatpush1.bf16.msra.mxu0 %v4438_v44  ;;  %1616 = vmatprep.mubr.bf16.mxu0 %v5072_v54  ;;  %v4525_v44 = vld [vmem:[#allocation6 + $0x530] ss:$20 sps:$4 sm:$0xff]  }
  0xa3   :  { %1586 = vmatprep.subr.bf16.mxu0 %v4446_v45  ;;  %v4533_v45 = vld [vmem:[#allocation6 + $0x50c] ss:$20 sps:$4 sm:$0xff]  }
  0xa4   :  { %1560 = vmatpush2.bf16.msra.mxu1 %v4441_v46  ;;  %v4528_v46 = vld [vmem:[#allocation6 + $0x3c8] ss:$20 sps:$4 sm:$0xff]  }
  0xa5   :  { %1561 = vmatprep.subr.bf16.mxu1 %v4449_v47  ;;  %v4534_v47 = vld [vmem:[#allocation6 + $0x268] ss:$20 sps:$4 sm:$0xff]  }
  0xa6   :  { %1587 = vmatpush1.bf16.msra.mxu0 %v4444_v48  ;;  %v4531_v48 = vld [vmem:[#allocation6 + $0x508] ss:$20 sps:$4 sm:$0xff]  }
  0xa7   :  { %1588 = vmatprep.subr.bf16.mxu0 %v4452_v49  ;;  %v4536_v49 = vld [vmem:[#allocation6 + $0x4e8] ss:$20 sps:$4 sm:$0xff]  }
  0xa8   :  { %1562 = vmatpush2.bf16.msra.mxu1 %v4447_v51  ;;  %v4535_v51 = vld [vmem:[#allocation6 + $0x128] ss:$20 sps:$4 sm:$0xff]  }
  0xa9   :  { %1563 = vmatprep.subr.bf16.mxu1 %v4455_v52  ;;  %v4538_v52 = vld [vmem:[#allocation6 + $0x240] ss:$20 sps:$4 sm:$0xff]  }
  0xaa   :  { %1589 = vmatpush1.bf16.msra.mxu0 %v4450_v53  ;;  %v4537_v53 = vld [vmem:[#allocation6 + $0x3a8] ss:$20 sps:$4 sm:$0xff]  }
  0xab   :  { %1590 = vmatprep.subr.bf16.mxu0 %v4458_v55  ;;  %v4540_v55 = vld [vmem:[#allocation6 + $0x4c0] ss:$20 sps:$4 sm:$0xff]  }
  0xac   :  { %1564 = vmatpush2.bf16.msra.mxu1 %v4453_v56  ;;  %v4539_v56 = vld [vmem:[#allocation6 + $0x100] ss:$20 sps:$4 sm:$0xff]  }
  0xad   :  { %1565 = vmatprep.subr.bf16.mxu1 %v4461_v57  ;;  %v4542_v57 = vld [vmem:[#allocation6 + $0x218] ss:$20 sps:$4 sm:$0xff]  }
  0xae   :  { %1591 = vmatpush1.bf16.msra.mxu0 %v4456_v58  ;;  %v4541_v58 = vld [vmem:[#allocation6 + $0x380] ss:$20 sps:$4 sm:$0xff]  }
  0xaf   :  { %1592 = vmatprep.subr.bf16.mxu0 %v4464_v59  ;;  %v4544_v59 = vld [vmem:[#allocation6 + $0x498] ss:$20 sps:$4 sm:$0xff]  }
  0xb0   :  { %1566 = vmatpush2.bf16.msra.mxu1 %v4459_v60  ;;  %v4543_v60 = vld [vmem:[#allocation6 + $0xd8] ss:$20 sps:$4 sm:$0xff]  }
  0xb1   :  { %1567 = vmatprep.subr.bf16.mxu1 %v4467_v61  ;;  %v4546_v61 = vld [vmem:[#allocation6 + $0x1f0] ss:$20 sps:$4 sm:$0xff]  }
  0xb2   :  { %1593 = vmatpush1.bf16.msra.mxu0 %v4462_v62  ;;  %v4545_v62 = vld [vmem:[#allocation6 + $0x358] ss:$20 sps:$4 sm:$0xff]  }
  0xb3   :  { %1594 = vmatprep.subr.bf16.mxu0 %v4470_v63  ;;  %v4548_v63 = vld [vmem:[#allocation6 + $0x470] ss:$20 sps:$4 sm:$0xff]  }
  0xb4   :  { %1568 = vmatpush2.bf16.msra.mxu1 %v4465_v0  ;;  %v4549_v0 = vld [vmem:[#allocation6 + $0x330] ss:$20 sps:$4 sm:$0xff]  }
  0xb5   :  { %1569 = vmatprep.subr.bf16.mxu1 %v4473_v2  ;;  %v4552_v2 = vld [vmem:[#allocation6 + $0x448] ss:$20 sps:$4 sm:$0xff]  }
  0xb6   :  { %1595 = vmatpush1.bf16.msra.mxu0 %v4468_v3  ;;  %v4554_v3 = vld [vmem:[#allocation6 + $0x1a0] ss:$20 sps:$4 sm:$0xff]  }
  0xb7   :  { %1596 = vmatprep.subr.bf16.mxu0 %v4476_v4  ;;  %v4553_v4 = vld [vmem:[#allocation6 + $0x308] ss:$20 sps:$4 sm:$0xff]  }
  0xb8   :  { %1570 = vmatpush2.bf16.msra.mxu1 %v4471_v5  ;;  %v4556_v5 = vld [vmem:[#allocation6 + $0x420] ss:$20 sps:$4 sm:$0xff]  }
  0xb9   :  { %1571 = vmatprep.subr.bf16.mxu1 %v4479_v6  ;;  %v4555_v6 = vld [vmem:[#allocation6 + $0x60] ss:$20 sps:$4 sm:$0xff]  }
  0xba   :  { %1597 = vmatpush1.bf16.msra.mxu0 %v4474_v7  ;;  %v4558_v7 = vld [vmem:[#allocation6 + $0x178] ss:$20 sps:$4 sm:$0xff]  }
  0xbb   :  { %1598 = vmatprep.subr.bf16.mxu0 %v4482_v9  ;;  %v4557_v9 = vld [vmem:[#allocation6 + $0x2e0] ss:$20 sps:$4 sm:$0xff]  }
  0xbc   :  { %1572 = vmatpush2.bf16.msra.mxu1 %v4477_v10  ;;  %v4559_v10 = vld [vmem:[#allocation6 + $0x38] ss:$20 sps:$4 sm:$0xff]  }
  0xbd   :  { %1573 = vmatprep.subr.bf16.mxu1 %v4485_v12  ;;  %v4560_v12 = vld [vmem:[#allocation6 + $0x3f8] ss:$20 sps:$4 sm:$0xff]  }
  0xbe   :  { %1599 = vmatpush1.bf16.msra.mxu0 %v4480_v13  ;;  %v4561_v13 = vld [vmem:[#allocation6 + $0x2b8] ss:$20 sps:$4 sm:$0xff]  }
  0xbf   :  { %1600 = vmatprep.subr.bf16.mxu0 %v4488_v14  ;;  %v4562_v14 = vld [vmem:[#allocation6 + $0x150] ss:$20 sps:$4 sm:$0xff]  }
  0xc0   :  { %1574 = vmatpush2.bf16.msra.mxu1 %v4483_v15  ;;  %v4564_v15 = vld [vmem:[#allocation6 + $0x3d0] ss:$20 sps:$4 sm:$0xff]  }
  0xc1   :  { %1625 = vmatprep.subr.bf16.mxu1 %v4491_v16  ;;  %v4563_v16 = vld [vmem:[#allocation6 + $0x10] ss:$20 sps:$4 sm:$0xff]  }
  0xc2   :  { %1601 = vmatpush2.bf16.msra.mxu0 %v4486_v17  ;;  %v4565_v17 = vld [vmem:[#allocation6 + $0x290] ss:$20 sps:$4 sm:$0xff]  }
  0xc3   :  { %1576 = vmatmul.mubr.bf16.vlgmr.msra.gmra.mxu1 %v5075_v8  ;;  %1602 = vmatprep.subr.bf16.mxu0 %v4494_v18  ;;  %v4576_v18 = vld [vmem:[#allocation8 + $0x11c] ss:$20 sps:$4 sm:$0xff]  }
  0xc4   :  { %1626 = vmatpush1.bf16.msra.mxu1 %v4489_v19  ;;  %1657 = vmatprep.mubr.bf16.mxu1 %v5000_v1  ;;  %v4566_v19 = vld [vmem:[#allocation6 + $0x628] ss:$20 sps:$4 sm:$0xff]  }
  0xc5   :  { %1627 = vmatprep.subr.bf16.mxu1 %v4497_v20  ;;  %v4574_v20 = vld [vmem:[#allocation8 + $0x118] ss:$20 sps:$4 sm:$0xff]  }
  0xc6   :  { %1603 = vmatpush2.bf16.msra.mxu0 %v4492_v21  ;;  %v5001_v21 = vmov 0.0  }
  0xc7   :  { %1604 = vmatprep.subr.bf16.mxu0 %v4500_v22  ;;  %v4579_v22 = vld [vmem:[#allocation8 + $0xf4] ss:$20 sps:$4 sm:$0xff]  }
  0xc8   :  { %1628 = vmatpush1.bf16.msra.mxu1 %v4495_v23  ;;  %v4567_v23 = vld [vmem:[#allocation6 + $0x600] ss:$20 sps:$4 sm:$0xff]  }
  0xc9   :  { %1629 = vmatprep.subr.bf16.mxu1 %v4503_v24  ;;  %v4577_v24 = vld [vmem:[#allocation8 + $0xf0] ss:$20 sps:$4 sm:$0xff]  }
  0xca   :  { %1605 = vmatpush2.bf16.msra.mxu0 %v4498_v25  ;;  %v4582_v25 = vld [vmem:[#allocation8 + $0xcc] ss:$20 sps:$4 sm:$0xff]  }
  0xcb   :  { %1606 = vmatprep.subr.bf16.mxu0 %v4506_v26  ;;  %v4568_v26 = vld [vmem:[#allocation6 + $0x5d8] ss:$20 sps:$4 sm:$0xff]  }
  0xcc   :  { %1630 = vmatpush1.bf16.msra.mxu1 %v4501_v27  ;;  %v4580_v27 = vld [vmem:[#allocation8 + $0xc8] ss:$20 sps:$4 sm:$0xff]  }
  0xcd   :  { %1631 = vmatprep.subr.bf16.mxu1 %v4509_v28  ;;  %v4585_v28 = vld [vmem:[#allocation8 + $0xa4] ss:$20 sps:$4 sm:$0xff]  }
  0xce   :  { %1607 = vmatpush2.bf16.msra.mxu0 %v4504_v29  ;;  %v4583_v29 = vld [vmem:[#allocation8 + $0xa0] ss:$20 sps:$4 sm:$0xff]  }
  0xcf   :  { %1608 = vmatprep.subr.bf16.mxu0 %v4512_v30  ;;  %v4588_v30 = vld [vmem:[#allocation8 + $0x7c] ss:$20 sps:$4 sm:$0xff]  }
  0xd0   :  { %1632 = vmatpush1.bf16.msra.mxu1 %v4507_v31  ;;  %v4586_v31 = vld [vmem:[#allocation8 + $0x78] ss:$20 sps:$4 sm:$0xff]  }
  0xd1   :  { %1633 = vmatprep.subr.bf16.mxu1 %v4515_v32  ;;  %v4591_v32 = vld [vmem:[#allocation8 + $0x54] ss:$20 sps:$4 sm:$0xff]  }
  0xd2   :  { %1609 = vmatpush2.bf16.msra.mxu0 %v4510_v33  ;;  %v4571_v33 = vld [vmem:[#allocation6 + $0x560] ss:$20 sps:$4 sm:$0xff]  }
  0xd3   :  { %1610 = vmatprep.subr.bf16.mxu0 %v4518_v34  ;;  %v4589_v34 = vld [vmem:[#allocation8 + $0x50] ss:$20 sps:$4 sm:$0xff]  }
  0xd4   :  { %1634 = vmatpush1.bf16.msra.mxu1 %v4513_v35  ;;  %v4594_v35 = vld [vmem:[#allocation8 + $0x2c] ss:$20 sps:$4 sm:$0xff]  }
  0xd5   :  { %1635 = vmatprep.subr.bf16.mxu1 %v4521_v36  ;;  %v4572_v36 = vld [vmem:[#allocation6 + $0x538] ss:$20 sps:$4 sm:$0xff]  }
  0xd6   :  { %1611 = vmatpush2.bf16.msra.mxu0 %v4516_v37  ;;  %v4592_v37 = vld [vmem:[#allocation8 + $0x28] ss:$20 sps:$4 sm:$0xff]  }
  0xd7   :  { %1612 = vmatprep.subr.bf16.mxu0 %v4524_v38  ;;  %v4597_v38 = vld [vmem:[#allocation8 + $0x4] ss:$20 sps:$4 sm:$0xff]  }
  0xd8   :  { %1636 = vmatpush1.bf16.msra.mxu1 %v4519_v39  ;;  %v4573_v39 = vld [vmem:[#allocation6 + $0x510] ss:$20 sps:$4 sm:$0xff]  }
  0xd9   :  { %1637 = vmatprep.subr.bf16.mxu1 %v4527_v40  ;;  %v4624_v40 = vld [vmem:[#allocation8 + $0x39c] ss:$20 sps:$4 sm:$0xff]  }
  0xda   :  { %1613 = vmatpush2.bf16.msra.mxu0 %v4522_v41  ;;  %v4595_v41 = vld [vmem:[#allocation8] ss:$20 sps:$4 sm:$0xff]  }
  0xdb   :  { %1614 = vmatprep.subr.bf16.mxu0 %v4530_v43  ;;  %v4600_v43 = vld [vmem:[#allocation8 + $0x25c] ss:$20 sps:$4 sm:$0xff]  }
  0xdc   :  { %1638 = vmatpush1.bf16.msra.mxu1 %v4525_v44  ;;  %v4622_v44 = vld [vmem:[#allocation8 + $0x398] ss:$20 sps:$4 sm:$0xff]  }
  0xdd   :  { %1639 = vmatprep.subr.bf16.mxu1 %v4533_v45  ;;  %v4627_v45 = vld [vmem:[#allocation8 + $0x374] ss:$20 sps:$4 sm:$0xff]  }
  0xde   :  { %1615 = vmatpush2.bf16.msra.mxu0 %v4528_v46  ;;  %v4598_v46 = vld [vmem:[#allocation8 + $0x258] ss:$20 sps:$4 sm:$0xff]  }
  0xdf   :  { %4124 = vmatprep.subr.bf16.mxu0 %v4534_v47  ;;  %v4603_v47 = vld [vmem:[#allocation8 + $0x234] ss:$20 sps:$4 sm:$0xff]  }
  0xe0   :  { %1640 = vmatpush1.bf16.msra.mxu1 %v4531_v48  ;;  %v4864_v48 = vld [vmem:[#allocation3 + $0x10] ss:$0 sps:$4 sm:$0xff]  }
  0xe1   :  { %1617 = vmatmul.mubr.bf16.vlgmr.msra.gmra.mxu0 %v5077_v11  ;;  %4146 = vmatprep.subr.bf16.mxu1 %v4536_v49  ;;  %v4601_v49 = vld [vmem:[#allocation8 + $0x230] ss:$20 sps:$4 sm:$0xff]  }
  0xe2   :  { %4125 = vmatpush3.bf16.msra.mxu0 %v4535_v51  ;;  %1698 = vmatprep.mubr.bf16.mxu0 %v5069_v50  ;;  %v4547_v50 = vld [vmem:[#allocation6 + $0xb0] ss:$20 sps:$4 sm:$0xff]  }
  0xe3   :  { %1658 = vmatmul.mubr.bf16.vlgmr.msra.gmra.mxu1 %v5083_v42  ;;  %4126 = vmatprep.subr.bf16.mxu0 %v4538_v52  ;;  %v4550_v42 = vld [vmem:[#allocation6 + $0x1c8] ss:$20 sps:$4 sm:$0xff]   ;;  %v4625_v51 = vld [vmem:[#allocation8 + $0x370] ss:$20 sps:$4 sm:$0xff]   ;;  %v4606_v52 = vld [vmem:[#allocation8 + $0x20c] ss:$20 sps:$4 sm:$0xff]  }
  0xe4   :  { %4147 = vmatpush3.bf16.msra.mxu1 %v4537_v53  ;;  %1738 = vmatprep.mubr.bf16.mxu1 %v5072_v54  ;;  %v4551_v54 = vld [vmem:[#allocation6 + $0x88] ss:$20 sps:$4 sm:$0xff]   ;;  %v4630_v53 = vld [vmem:[#allocation8 + $0x34c] ss:$20 sps:$4 sm:$0xff]  }
  0xe5   :  { %4148 = vmatprep.subr.bf16.mxu1 %v4540_v55  ;;  %v4604_v55 = vld [vmem:[#allocation8 + $0x208] ss:$20 sps:$4 sm:$0xff]  }
  0xe6   :  { %4127 = vmatpush3.bf16.msra.mxu0 %v4539_v56  ;;  %v4628_v56 = vld [vmem:[#allocation8 + $0x348] ss:$20 sps:$4 sm:$0xff]  }
  0xe7   :  { %4128 = vmatprep.subr.bf16.mxu0 %v4542_v57  ;;  %v4609_v57 = vld [vmem:[#allocation8 + $0x1e4] ss:$20 sps:$4 sm:$0xff]  }
  0xe8   :  { %4149 = vmatpush3.bf16.msra.mxu1 %v4541_v58  ;;  %v4633_v58 = vld [vmem:[#allocation8 + $0x324] ss:$20 sps:$4 sm:$0xff]  }
  0xe9   :  { %4150 = vmatprep.subr.bf16.mxu1 %v4544_v59  ;;  %v4607_v59 = vld [vmem:[#allocation8 + $0x1e0] ss:$20 sps:$4 sm:$0xff]  }
  0xea   :  { %4129 = vmatpush3.bf16.msra.mxu0 %v4543_v60  ;;  %v4631_v60 = vld [vmem:[#allocation8 + $0x320] ss:$20 sps:$4 sm:$0xff]  }
  0xeb   :  { %4130 = vmatprep.subr.bf16.mxu0 %v4546_v61  ;;  %v4612_v61 = vld [vmem:[#allocation8 + $0x1bc] ss:$20 sps:$4 sm:$0xff]  }
  0xec   :  { %4151 = vmatpush3.bf16.msra.mxu1 %v4545_v62  ;;  %v4636_v62 = vld [vmem:[#allocation8 + $0x2fc] ss:$20 sps:$4 sm:$0xff]  }
  0xed   :  { %4152 = vmatprep.subr.bf16.mxu1 %v4548_v63  ;;  %v4610_v63 = vld [vmem:[#allocation8 + $0x1b8] ss:$20 sps:$4 sm:$0xff]  }
  0xee   :  { %4131 = vmatpush3.bf16.msra.mxu0 %v4547_v50  ;;  %v4634_v50 = vld [vmem:[#allocation8 + $0x2f8] ss:$20 sps:$4 sm:$0xff]  }
  0xef   :  { %4132 = vmatprep.subr.bf16.mxu0 %v4550_v42  ;;  %v4639_v42 = vld [vmem:[#allocation8 + $0x2d4] ss:$20 sps:$4 sm:$0xff]  }
  0xf0   :  { %4153 = vmatpush3.bf16.msra.mxu1 %v4549_v0  ;;  %v4615_v0 = vld [vmem:[#allocation8 + $0x194] ss:$20 sps:$4 sm:$0xff]  }
  0xf1   :  { %4154 = vmatprep.subr.bf16.mxu1 %v4552_v2  ;;  %v4613_v2 = vld [vmem:[#allocation8 + $0x190] ss:$20 sps:$4 sm:$0xff]  }
  0xf2   :  { %4133 = vmatpush3.bf16.msra.mxu0 %v4551_v54  ;;  %v4637_v54 = vld [vmem:[#allocation8 + $0x2d0] ss:$20 sps:$4 sm:$0xff]  }
  0xf3   :  { %4134 = vmatprep.subr.bf16.mxu0 %v4554_v3  ;;  %v4642_v3 = vld [vmem:[#allocation8 + $0x2ac] ss:$20 sps:$4 sm:$0xff]  }
  0xf4   :  { %4155 = vmatpush3.bf16.msra.mxu1 %v4553_v4  ;;  %v4618_v4 = vld [vmem:[#allocation8 + $0x16c] ss:$20 sps:$4 sm:$0xff]  }
  0xf5   :  { %4156 = vmatprep.subr.bf16.mxu1 %v4556_v5  ;;  %v4616_v5 = vld [vmem:[#allocation8 + $0x168] ss:$20 sps:$4 sm:$0xff]  }
  0xf6   :  { %4135 = vmatpush3.bf16.msra.mxu0 %v4555_v6  ;;  %v4640_v6 = vld [vmem:[#allocation8 + $0x2a8] ss:$20 sps:$4 sm:$0xff]  }
  0xf7   :  { %4136 = vmatprep.subr.bf16.mxu0 %v4558_v7  ;;  %v4645_v7 = vld [vmem:[#allocation8 + $0x284] ss:$20 sps:$4 sm:$0xff]  }
  0xf8   :  { %4157 = vmatpush3.bf16.msra.mxu1 %v4557_v9  ;;  %v4621_v9 = vld [vmem:[#allocation8 + $0x144] ss:$20 sps:$4 sm:$0xff]  }
  0xf9   :  { %4158 = vmatprep.subr.bf16.mxu1 %v4560_v12  ;;  %v4648_v12 = vld [vmem:[#allocation8 + $0x4dc] ss:$20 sps:$4 sm:$0xff]  }
  0xfa   :  { %4137 = vmatpush3.bf16.msra.mxu0 %v4559_v10  ;;  %v4643_v10 = vld [vmem:[#allocation8 + $0x280] ss:$20 sps:$4 sm:$0xff]  }
  0xfb   :  { %4138 = vmatprep.subr.bf16.mxu0 %v4562_v14  ;;  %v4646_v14 = vld [vmem:[#allocation8 + $0x4d8] ss:$20 sps:$4 sm:$0xff]  }
  0xfc   :  { %4159 = vmatpush3.bf16.msra.mxu1 %v4561_v13  ;;  %v4619_v13 = vld [vmem:[#allocation8 + $0x140] ss:$20 sps:$4 sm:$0xff]  }
  0xfd   :  { %4160 = vmatprep.subr.bf16.mxu1 %v4564_v15  ;;  %v4651_v15 = vld [vmem:[#allocation8 + $0x4b4] ss:$20 sps:$4 sm:$0xff]  }
  0xfe   :  { %4139 = vmatpush3.bf16.msra.mxu0 %v4563_v16 }
  0xff   :  { %4232 = vmatprep.subr.bf16.mxu0 %v5001_v21 }
 0x100   :  { %4161 = vmatpush3.bf16.msra.mxu1 %v4565_v17  ;;  %v4649_v17 = vld [vmem:[#allocation8 + $0x4b0] ss:$20 sps:$4 sm:$0xff]  }
 0x101   :  { %1699 = vmatmul.mubr.bf16.vlgmr.msra.gmra.mxu0 %v5075_v8  ;;  %3103 = vmatprep.subr.bf16.mxu1 %v4576_v18  ;;  %v4569_v8 = vld [vmem:[#allocation6 + $0x5b0] ss:$20 sps:$4 sm:$0xff]  }
 0x102   :  { %4233 = vmatpush3.bf16.msra.mxu0 %v4566_v19  ;;  %4248 = vmatprep.mubr.msk.bf16.mxu0 %vm5002_vm0, %v5001_v21 }
 0x103   :  { %1739 = vmatmul.mubr.bf16.vlgmr.msra.gmra.mxu1 %v5077_v11  ;;  %4234 = vmatprep.subr.bf16.mxu0 %v5001_v21  ;;  %v4570_v11 = vld [vmem:[#allocation6 + $0x588] ss:$20 sps:$4 sm:$0xff]  }
 0x104   :  { %3104 = vmatpush1.bf16.msra.mxu1 %v4574_v20  ;;  %v4654_v20 = vld [vmem:[#allocation8 + $0x48c] ss:$20 sps:$4 sm:$0xff]  }
 0x105   :  { %3105 = vmatprep.subr.bf16.mxu1 %v4579_v22 }
 0x106   :  { %4235 = vmatpush3.bf16.msra.mxu0 %v4567_v23 }
 0x107   :  { %4236 = vmatprep.subr.bf16.mxu0 %v5001_v21 }
 0x108   :  { %3106 = vmatpush1.bf16.msra.mxu1 %v4577_v24  ;;  %v4652_v24 = vld [vmem:[#allocation8 + $0x488] ss:$20 sps:$4 sm:$0xff]  }
 0x109   :  { %3107 = vmatprep.subr.bf16.mxu1 %v4582_v25  ;;  %v4693_v25 = vld [vmem:[#allocation8 + $0x61c] ss:$20 sps:$4 sm:$0xff]  }
 0x10a   :  { %4237 = vmatpush3.bf16.msra.mxu0 %v4568_v26 }
 0x10b   :  { %4238 = vmatprep.subr.bf16.mxu0 %v5001_v21 }
 0x10c   :  { %3108 = vmatpush1.bf16.msra.mxu1 %v4580_v27 }
 0x10d   :  { %3109 = vmatprep.subr.bf16.mxu1 %v4585_v28 }
 0x10e   :  { %4239 = vmatpush3.bf16.msra.mxu0 %v4569_v8  ;;  %v4657_v8 = vld [vmem:[#allocation8 + $0x464] ss:$20 sps:$4 sm:$0xff]  }
 0x10f   :  { %4240 = vmatprep.subr.bf16.mxu0 %v5001_v21 }
 0x110   :  { %3110 = vmatpush1.bf16.msra.mxu1 %v4583_v29  ;;  %v4655_v29 = vld [vmem:[#allocation8 + $0x460] ss:$20 sps:$4 sm:$0xff]  }
 0x111   :  { %3111 = vmatprep.subr.bf16.mxu1 %v4588_v30  ;;  %v4660_v30 = vld [vmem:[#allocation8 + $0x43c] ss:$20 sps:$4 sm:$0xff]  }
 0x112   :  { %4241 = vmatpush3.bf16.msra.mxu0 %v4570_v11  ;;  %v337_v11 = vlaneseq }
 0x113   :  { %4242 = vmatprep.subr.bf16.mxu0 %v5001_v21 }
 0x114   :  { %3112 = vmatpush1.bf16.msra.mxu1 %v4586_v31  ;;  %v4658_v31 = vld [vmem:[#allocation8 + $0x438] ss:$20 sps:$4 sm:$0xff]  }
 0x115   :  { %3113 = vmatprep.subr.bf16.mxu1 %v4591_v32  ;;  %v4663_v32 = vld [vmem:[#allocation8 + $0x414] ss:$20 sps:$4 sm:$0xff]  }
 0x116   :  { %4243 = vmatpush3.bf16.msra.mxu0 %v4571_v33  ;;  %v5105_v33 = vshrl.u32 %v337_v11, 7 }
 0x117   :  { %4244 = vmatprep.subr.bf16.mxu0 %v5001_v21 }
 0x118   :  { %3114 = vmatpush1.bf16.msra.mxu1 %v4589_v34  ;;  %v4661_v34 = vld [vmem:[#allocation8 + $0x410] ss:$20 sps:$4 sm:$0xff]  }
 0x119   :  { %3115 = vmatprep.subr.bf16.mxu1 %v4594_v35  ;;  %v4666_v35 = vld [vmem:[#allocation8 + $0x3ec] ss:$20 sps:$4 sm:$0xff]  }
 0x11a   :  { %4245 = vmatpush3.bf16.msra.mxu0 %v4572_v36  ;;  %v5108_v36 = vsub.s32 0, %v5105_v33 }
 0x11b   :  { %4246 = vmatprep.subr.bf16.mxu0 %v5001_v21 }
 0x11c   :  { %3116 = vmatpush1.bf16.msra.mxu1 %v4592_v37  ;;  %v5113_v37 = vld [vmem:[%s5198_s2] sm:$0x1f]  ;;  %s5003_s2 = smov [#allocation12]  }
 0x11d   :  { %3117 = vmatprep.subr.bf16.mxu1 %v4597_v38  ;;  %v343_v38 = vsub.s32 1, %v5105_v33  ;;  %s3708_s27 = sshll.u32 %s5003_s2, 4  ;;  %s3709_s27 = int_to_ptr.vmem [resolvable:$true] %s3708_s27 }
 0x11e   :  { %4247 = vmatpush3.bf16.msra.mxu0 %v4573_v39  ;;  %v4664_v39 = vld [vmem:[#allocation8 + $0x3e8] ss:$20 sps:$4 sm:$0xff]   ;;  %s4965_s28 = scalar_lea.vmem %s3709_s27, 16  ;;  %s4969_s29 = scalar_lea.vmem %s3709_s27, 32 }
 0x11f   :  { %3144 = vmatprep.subr.bf16.mxu0 %v4624_v40  ;;  %v4669_v40 = vld [vmem:[#allocation8 + $0x3c4] ss:$20 sps:$4 sm:$0xff]   ;;  %p4966_p11 = scmp.ne.s32.totalorder %s3709_s27, %s4965_s28  ;;  %p4970_p12 = scmp.lt.s32.totalorder %s3709_s27, %s3709_s27 }
 0x120   :  { %3118 = vmatpush1.bf16.msra.mxu1 %v4595_v41  ;;  %v340_v41 = vrot.slane %v5113_v37, %v5108_v36  ;;  %p4971_p13 = scmp.lt.s32.totalorder %s4969_s29, %s4965_s28 }
 0x121   :  { %4249 = vmatmul.mubr.bf16.vlgmr.msra.gmra.mxu0 %v4864_v48  ;;  %3119 = vmatprep.subr.bf16.mxu1 %v4600_v43  ;;  %v344_v43 = vrot.slane %v5113_v37, %v343_v38 }
 0x122   :  { %3145 = vmatpush1.bf16.msra.mxu0 %v4622_v44  ;;  %v4667_v44 = vld [vmem:[#allocation8 + $0x3c0] ss:$20 sps:$4 sm:$0xff]   ;;  %p4972_p0 = por %p4971_p13, %p4970_p12 }
 0x123   :  { %3146 = vmatprep.subr.bf16.mxu0 %v4627_v45  ;;  %v4672_v45 = vld [vmem:[#allocation8 + $0x124] ss:$20 sps:$4 sm:$0xff]  }
 0x124   :  { %3120 = vmatpush2.bf16.msra.mxu1 %v4598_v46  ;;  %p4973_p1 = pnand %p4972_p0, %p4966_p11 }
 0x125   :  { %3121 = vmatprep.subr.bf16.mxu1 %v4603_v47 }
 0x126   :  { %3147 = vmatpush1.bf16.msra.mxu0 %v4625_v51 }
 0x127   :  { %3148 = vmatprep.subr.bf16.mxu0 %v4630_v53 }
 0x128   :  { %3122 = vmatpush2.bf16.msra.mxu1 %v4601_v49 }
 0x129   :  { %3123 = vmatprep.subr.bf16.mxu1 %v4606_v52 }
 0x12a   :  { %3149 = vmatpush1.bf16.msra.mxu0 %v4628_v56 }
 0x12b   :  { %3150 = vmatprep.subr.bf16.mxu0 %v4633_v58 }
 0x12c   :  { %3124 = vmatpush2.bf16.msra.mxu1 %v4604_v55 }
 0x12d   :  { %3125 = vmatprep.subr.bf16.mxu1 %v4609_v57 }
 0x12e   :  { %3151 = vmatpush1.bf16.msra.mxu0 %v4631_v60 }
 0x12f   :  { %3152 = vmatprep.subr.bf16.mxu0 %v4636_v62 }
 0x130   :  { %3126 = vmatpush2.bf16.msra.mxu1 %v4607_v59 }
 0x131   :  { %3127 = vmatprep.subr.bf16.mxu1 %v4612_v61  ;;  %v4691_v61 = vld [vmem:[#allocation8 + $0x618] ss:$20 sps:$4 sm:$0xff]  }
 0x132   :  { %3153 = vmatpush1.bf16.msra.mxu0 %v4634_v50  ;;  %v4697_v50 = vld [vmem:[#allocation8 + $0x5f0] ss:$20 sps:$4 sm:$0xff]  }
 0x133   :  { %3154 = vmatprep.subr.bf16.mxu0 %v4639_v42  ;;  %v4705_v42 = vld [vmem:[#allocation8 + $0x5cc] ss:$20 sps:$4 sm:$0xff]  }
 0x134   :  { %3128 = vmatpush2.bf16.msra.mxu1 %v4610_v63  ;;  %v4699_v63 = vld [vmem:[#allocation8 + $0x5f4] ss:$20 sps:$4 sm:$0xff]  }
 0x135   :  { %3129 = vmatprep.subr.bf16.mxu1 %v4615_v0  ;;  %v4703_v0 = vld [vmem:[#allocation8 + $0x5c8] ss:$20 sps:$4 sm:$0xff]  }
 0x136   :  { %3155 = vmatpush1.bf16.msra.mxu0 %v4637_v54  ;;  %v4709_v54 = vld [vmem:[#allocation8 + $0x5a0] ss:$20 sps:$4 sm:$0xff]  }
 0x137   :  { %3156 = vmatprep.subr.bf16.mxu0 %v4642_v3  ;;  %v4717_v3 = vld [vmem:[#allocation8 + $0x57c] ss:$20 sps:$4 sm:$0xff]  }
 0x138   :  { %3130 = vmatpush2.bf16.msra.mxu1 %v4613_v2  ;;  %v4711_v2 = vld [vmem:[#allocation8 + $0x5a4] ss:$20 sps:$4 sm:$0xff]  }
 0x139   :  { %3131 = vmatprep.subr.bf16.mxu1 %v4618_v4  ;;  %v4715_v4 = vld [vmem:[#allocation8 + $0x578] ss:$20 sps:$4 sm:$0xff]  }
 0x13a   :  { %3157 = vmatpush1.bf16.msra.mxu0 %v4640_v6  ;;  %v4721_v6 = vld [vmem:[#allocation8 + $0x550] ss:$20 sps:$4 sm:$0xff]  }
 0x13b   :  { %3158 = vmatprep.subr.bf16.mxu0 %v4645_v7  ;;  %v4729_v7 = vld [vmem:[#allocation8 + $0x52c] ss:$20 sps:$4 sm:$0xff]  }
 0x13c   :  { %3132 = vmatpush2.bf16.msra.mxu1 %v4616_v5  ;;  %v4723_v5 = vld [vmem:[#allocation8 + $0x554] ss:$20 sps:$4 sm:$0xff]  }
 0x13d   :  { %3133 = vmatprep.subr.bf16.mxu1 %v4621_v9  ;;  %v4727_v9 = vld [vmem:[#allocation8 + $0x528] ss:$20 sps:$4 sm:$0xff]  }
 0x13e   :  { %3159 = vmatpush1.bf16.msra.mxu0 %v4643_v10  ;;  %v4735_v10 = vld [vmem:[#allocation8 + $0x504] ss:$20 sps:$4 sm:$0xff]  }
 0x13f   :  { %3160 = vmatprep.subr.bf16.mxu0 %v4648_v12 }
 0x140   :  { %3134 = vmatpush2.bf16.msra.mxu1 %v4619_v13  ;;  %v4733_v13 = vld [vmem:[#allocation8 + $0x500] ss:$20 sps:$4 sm:$0xff]  }
 0x141   :  { %v1454_v16 = vpop.f32.mrf.mxu0  ;;  %3185 = vmatprep.subr.bf16.mxu1 %v4693_v25 }
 0x142   :  { %3161 = vmatpush2.bf16.msra.mxu0 %v4646_v14  ;;  %v1455_v46 = vadd.f32 %v1454_v16, %v340_v41 }
 0x143   :  { %v1456_v18 = vpop.f32.mrf.mxu0  ;;  %v1495_v19 = vpop.f32.mrf.mxu1  ;;  %3162 = vmatprep.subr.bf16.mxu0 %v4651_v15  ;;  %v4741_v15 = vld [vmem:[#allocation8 + $0x3a4] ss:$20 sps:$4 sm:$0xff]  }
 0x144   :  { %v1457_v47 = vadd.f32 %v1456_v18, %v344_v43  ;;  %v1496_v48 = vadd.f32 %v1495_v19, %v1455_v46  ;;  %v347_v18 = vsub.s32 2, %v5105_v33  ;;  %v351_v19 = vsub.s32 3, %v5105_v33  ;;  %v4670_v43 = vld [vmem:[#allocation8 + $0x120] ss:$20 sps:$4 sm:$0xff]   ;;  %v4673_v46 = vld [vmem:[#allocation8 + $0xf8] ss:$20 sps:$4 sm:$0xff]  }
 0x145   :  { %v1458_v22 = vpop.f32.mrf.mxu0  ;;  %v1497_v23 = vpop.f32.mrf.mxu1 }
 0x146   :  { %3163 = vmatpush2.bf16.msra.mxu0 %v4649_v17  ;;  %v1498_v51 = vadd.f32 %v1497_v23, %v1457_v47  ;;  %v352_v22 = vrot.slane %v5113_v37, %v351_v19  ;;  %v4678_v47 = vld [vmem:[#allocation8 + $0xd4] ss:$20 sps:$4 sm:$0xff]  }
 0x147   :  { %v1459_v26 = vpop.f32.mrf.mxu0  ;;  %v1499_v27 = vpop.f32.mrf.mxu1  ;;  %3164 = vmatprep.subr.bf16.mxu0 %v4654_v20  ;;  %v348_v20 = vrot.slane %v5113_v37, %v347_v18 }
 0x149   :  { %v1500_v28 = vpop.f32.mrf.mxu1 }
 0x14a   :  { %3165 = vmatpush2.bf16.msra.mxu0 %v4652_v24 }
 0x14b   :  { %3166 = vmatprep.subr.bf16.mxu0 %v4657_v8 }
 0x14e   :  { %3167 = vmatpush2.bf16.msra.mxu0 %v4655_v29 }
 0x14f   :  { %3168 = vmatprep.subr.bf16.mxu0 %v4660_v30 }
 0x152   :  { %3169 = vmatpush2.bf16.msra.mxu0 %v4658_v31 }
 0x153   :  { %3170 = vmatprep.subr.bf16.mxu0 %v4663_v32 }
 0x156   :  { %3171 = vmatpush2.bf16.msra.mxu0 %v4661_v34 }
 0x157   :  { %3172 = vmatprep.subr.bf16.mxu0 %v4666_v35 }
 0x15a   :  { %3173 = vmatpush2.bf16.msra.mxu0 %v4664_v39 }
 0x15b   :  { %3174 = vmatprep.subr.bf16.mxu0 %v4669_v40 }
 0x15e   :  { %3175 = vmatpush2.bf16.msra.mxu0 %v4667_v44 }
 0x15f   :  { %3226 = vmatprep.subr.bf16.mxu0 %v4672_v45  ;;  %v4675_v45 = vld [vmem:[#allocation8 + $0xfc] ss:$20 sps:$4 sm:$0xff]  }
 0x161   :  { %v1536_v49 = vpop.f32.mrf.mxu0 }
 0x162   :  { %v1537_v52 = vadd.f32 %v1536_v49, %v1496_v48  ;;  %v4676_v48 = vld [vmem:[#allocation8 + $0xd0] ss:$20 sps:$4 sm:$0xff]   ;;  %v4681_v49 = vld [vmem:[#allocation8 + $0xac] ss:$20 sps:$4 sm:$0xff]  }
 0x163   :  { %v1538_v53 = vpop.f32.mrf.mxu0 }
 0x164   :  { %v1539_v55 = vadd.f32 %v1538_v53, %v1498_v51  ;;  %v1786_v56 = vmax.f32 %v1537_v52, 0.0  ;;  %v4679_v51 = vld [vmem:[#allocation8 + $0xa8] ss:$20 sps:$4 sm:$0xff]   ;;  %v4684_v52 = vld [vmem:[#allocation8 + $0x84] ss:$20 sps:$4 sm:$0xff]  }
 0x165   :  { %v1540_v57 = vpop.f32.mrf.mxu0  ;;  %v4682_v53 = vld [vmem:[#allocation8 + $0x80] ss:$20 sps:$4 sm:$0xff]  }
 0x166   :  { %v1787_v58 = vmax.f32 %v1539_v55, 0.0  ;;  %v5123_v62 = vpack.c.bf16 %v1786_v56, %v1786_v56  ;;  %v4687_v55 = vld [vmem:[#allocation8 + $0x5c] ss:$20 sps:$4 sm:$0xff]   ;;  %v4685_v56 = vld [vmem:[#allocation8 + $0x58] ss:$20 sps:$4 sm:$0xff]  }
 0x167   :  { %v1541_v59 = vpop.f32.mrf.mxu0  ;;  %v4690_v57 = vld [vmem:[#allocation8 + $0x34] ss:$20 sps:$4 sm:$0xff]  }
 0x168   :  { %v5121_v60 = vpack.c.bf16 %v1787_v58, %v1787_v58  ;;  %v4688_v59 = vld [vmem:[#allocation8 + $0x30] ss:$20 sps:$4 sm:$0xff]  }
 0x16a   :  { %3135 = vmatprep.mubr.bf16.mxu1 %v5121_v60 }
 0x16b   :  { %3136 = vmatmul.mubr.bf16.vlgmr.msra.gmra.mxu1 %v5123_v62 }
 0x16c   :  { %3186 = vmatpush1.bf16.msra.mxu1 %v4691_v61  ;;  %3217 = vmatprep.mubr.bf16.mxu1 %v5000_v1 }
 0x16d   :  { %3187 = vmatprep.subr.bf16.mxu1 %v4699_v63 }
 0x170   :  { %3188 = vmatpush1.bf16.msra.mxu1 %v4697_v50  ;;  %v4696_v50 = vld [vmem:[#allocation8 + $0xc] ss:$20 sps:$4 sm:$0xff]  }
 0x171   :  { %3189 = vmatprep.subr.bf16.mxu1 %v4705_v42 }
 0x174   :  { %3190 = vmatpush1.bf16.msra.mxu1 %v4703_v0 }
 0x175   :  { %3191 = vmatprep.subr.bf16.mxu1 %v4711_v2  ;;  %v4694_v2 = vld [vmem:[#allocation8 + $0x8] ss:$20 sps:$4 sm:$0xff]  }
 0x178   :  { %3192 = vmatpush1.bf16.msra.mxu1 %v4709_v54 }
 0x179   :  { %3193 = vmatprep.subr.bf16.mxu1 %v4717_v3  ;;  %v4702_v3 = vld [vmem:[#allocation8 + $0x264] ss:$20 sps:$4 sm:$0xff]  }
 0x17c   :  { %3194 = vmatpush1.bf16.msra.mxu1 %v4715_v4 }
 0x17d   :  { %3195 = vmatprep.subr.bf16.mxu1 %v4723_v5 }
 0x180   :  { %3196 = vmatpush1.bf16.msra.mxu1 %v4721_v6  ;;  %v4700_v6 = vld [vmem:[#allocation8 + $0x260] ss:$20 sps:$4 sm:$0xff]  }
 0x181   :  { %3197 = vmatprep.subr.bf16.mxu1 %v4729_v7  ;;  %v4708_v7 = vld [vmem:[#allocation8 + $0x23c] ss:$20 sps:$4 sm:$0xff]  }
 0x183   :  { %v1577_v12 = vpop.f32.mrf.mxu1 }
 0x184   :  { %3198 = vmatpush1.bf16.msra.mxu1 %v4727_v9  ;;  %v1578_v23 = vadd.f32 %v1577_v12, %v348_v20  ;;  %v4706_v9 = vld [vmem:[#allocation8 + $0x238] ss:$20 sps:$4 sm:$0xff]   ;;  %v4712_v12 = vld [vmem:[#allocation8 + $0x210] ss:$20 sps:$4 sm:$0xff]  }
 0x185   :  { %v1579_v14 = vpop.f32.mrf.mxu1  ;;  %3199 = vmatprep.subr.bf16.mxu1 %v4735_v10  ;;  %v4714_v10 = vld [vmem:[#allocation8 + $0x214] ss:$20 sps:$4 sm:$0xff]  }
 0x186   :  { %v1580_v25 = vadd.f32 %v1579_v14, %v352_v22  ;;  %v355_v14 = vsub.s32 4, %v5105_v33  ;;  %v4724_v22 = vld [vmem:[#allocation8 + $0x1c0] ss:$20 sps:$4 sm:$0xff]  }
 0x187   :  { %v1581_v16 = vpop.f32.mrf.mxu1 }
 0x188   :  { %3200 = vmatpush1.bf16.msra.mxu1 %v4733_v13  ;;  %v4720_v13 = vld [vmem:[#allocation8 + $0x1ec] ss:$20 sps:$4 sm:$0xff]   ;;  %v4726_v16 = vld [vmem:[#allocation8 + $0x1c4] ss:$20 sps:$4 sm:$0xff]  }
 0x189   :  { %v1582_v17 = vpop.f32.mrf.mxu1  ;;  %3267 = vmatprep.subr.bf16.mxu1 %v4741_v15  ;;  %v4718_v15 = vld [vmem:[#allocation8 + $0x1e8] ss:$20 sps:$4 sm:$0xff]  }
 0x18a   :  { %v356_v17 = vrot.slane %v5113_v37, %v355_v14 }
 0x1a1   :  { %v1618_v24 = vpop.f32.mrf.mxu0 }
 0x1a2   :  { %v1619_v26 = vadd.f32 %v1618_v24, %v1578_v23  ;;  %v4732_v23 = vld [vmem:[#allocation8 + $0x19c] ss:$20 sps:$4 sm:$0xff]  }
 0x1a3   :  { %v1620_v27 = vpop.f32.mrf.mxu0  ;;  %v1659_v8 = vpop.f32.mrf.mxu1 }
 0x1a4   :  { %v1621_v28 = vadd.f32 %v1620_v27, %v1580_v25  ;;  %v1660_v29 = vadd.f32 %v1659_v8, %v1619_v26  ;;  %v4730_v26 = vld [vmem:[#allocation8 + $0x198] ss:$20 sps:$4 sm:$0xff]   ;;  %v4738_v27 = vld [vmem:[#allocation8 + $0x174] ss:$20 sps:$4 sm:$0xff]  }
 0x1a5   :  { %v1622_v30 = vpop.f32.mrf.mxu0  ;;  %v1661_v11 = vpop.f32.mrf.mxu1 }
 0x1a6   :  { %v1662_v31 = vadd.f32 %v1661_v11, %v1621_v28  ;;  %v1788_v32 = vmax.f32 %v1660_v29, 0.0  ;;  %v4736_v30 = vld [vmem:[#allocation8 + $0x170] ss:$20 sps:$4 sm:$0xff]  }
 0x1a7   :  { %v1623_v34 = vpop.f32.mrf.mxu0  ;;  %v1663_v35 = vpop.f32.mrf.mxu1 }
 0x1a8   :  { %v1789_v39 = vmax.f32 %v1662_v31, 0.0  ;;  %v5138_v44 = vpack.c.bf16 %v1788_v32, %v1788_v32  ;;  %v4744_v31 = vld [vmem:[#allocation8 + $0x14c] ss:$20 sps:$4 sm:$0xff]  }
 0x1a9   :  { %v1664_v40 = vpop.f32.mrf.mxu1  ;;  %v4739_v34 = vld [vmem:[#allocation8 + $0x3a0] ss:$20 sps:$4 sm:$0xff]  }
 0x1aa   :  { %v5136_v41 = vpack.c.bf16 %v1789_v39, %v1789_v39  ;;  %v4742_v39 = vld [vmem:[#allocation8 + $0x148] ss:$20 sps:$4 sm:$0xff]  }
 0x1ab   :  { %v4747_v40 = vld [vmem:[#allocation8 + $0x37c] ss:$20 sps:$4 sm:$0xff]  }
 0x1ac   :  { %3176 = vmatprep.mubr.bf16.mxu0 %v5136_v41 }
 0x1ad   :  { %3177 = vmatmul.mubr.bf16.vlgmr.msra.gmra.mxu0 %v5138_v44 }
 0x1ae   :  { %3227 = vmatpush1.bf16.msra.mxu0 %v4670_v43  ;;  %3258 = vmatprep.mubr.bf16.mxu0 %v5121_v60 }
 0x1af   :  { %3228 = vmatprep.subr.bf16.mxu0 %v4675_v45  ;;  %v4750_v45 = vld [vmem:[#allocation8 + $0x624] ss:$20 sps:$4 sm:$0xff]  }
 0x1b2   :  { %3229 = vmatpush1.bf16.msra.mxu0 %v4673_v46  ;;  %v4745_v46 = vld [vmem:[#allocation8 + $0x378] ss:$20 sps:$4 sm:$0xff]  }
 0x1b3   :  { %3230 = vmatprep.subr.bf16.mxu0 %v4678_v47  ;;  %v4748_v47 = vld [vmem:[#allocation8 + $0x620] ss:$20 sps:$4 sm:$0xff]  }
 0x1b6   :  { %3231 = vmatpush1.bf16.msra.mxu0 %v4676_v48  ;;  %v4753_v48 = vld [vmem:[#allocation8 + $0x354] ss:$20 sps:$4 sm:$0xff]  }
 0x1b7   :  { %3232 = vmatprep.subr.bf16.mxu0 %v4681_v49  ;;  %v4756_v49 = vld [vmem:[#allocation8 + $0x5fc] ss:$20 sps:$4 sm:$0xff]  }
 0x1ba   :  { %3233 = vmatpush1.bf16.msra.mxu0 %v4679_v51  ;;  %v4751_v51 = vld [vmem:[#allocation8 + $0x350] ss:$20 sps:$4 sm:$0xff]  }
 0x1bb   :  { %3234 = vmatprep.subr.bf16.mxu0 %v4684_v52  ;;  %v4754_v52 = vld [vmem:[#allocation8 + $0x5f8] ss:$20 sps:$4 sm:$0xff]  }
 0x1be   :  { %3235 = vmatpush1.bf16.msra.mxu0 %v4682_v53  ;;  %v4759_v53 = vld [vmem:[#allocation8 + $0x32c] ss:$20 sps:$4 sm:$0xff]  }
 0x1bf   :  { %3236 = vmatprep.subr.bf16.mxu0 %v4687_v55  ;;  %v4762_v55 = vld [vmem:[#allocation8 + $0x5d4] ss:$20 sps:$4 sm:$0xff]  }
 0x1c1   :  { %v4140_v58 = vpop.f32.mrf.mxu0 }
 0x1c2   :  { %3237 = vmatpush1.bf16.msra.mxu0 %v4685_v56  ;;  %v4757_v56 = vld [vmem:[#allocation8 + $0x328] ss:$20 sps:$4 sm:$0xff]  }
 0x1c3   :  { %v4141_v61 = vpop.f32.mrf.mxu0  ;;  %v4162_v63 = vpop.f32.mrf.mxu1  ;;  %3238 = vmatprep.subr.bf16.mxu0 %v4690_v57  ;;  %v4760_v57 = vld [vmem:[#allocation8 + $0x5d0] ss:$20 sps:$4 sm:$0xff]  }
 0x1c4   :  { %v4142_v20 = vadd.f32 %v4141_v61, %v4140_v58  ;;  %v4765_v58 = vld [vmem:[#allocation8 + $0x304] ss:$20 sps:$4 sm:$0xff]   ;;  %v4763_v61 = vld [vmem:[#allocation8 + $0x300] ss:$20 sps:$4 sm:$0xff]  }
 0x1c5   :  { %v4143_v42 = vpop.f32.mrf.mxu0  ;;  %v4163_v0 = vpop.f32.mrf.mxu1 }
 0x1c6   :  { %3239 = vmatpush1.bf16.msra.mxu0 %v4688_v59  ;;  %v1701_v24 = vadd.f32 %v4142_v20, %v356_v17  ;;  %v4164_v25 = vadd.f32 %v4163_v0, %v4162_v63  ;;  %v4768_v59 = vld [vmem:[#allocation8 + $0x5ac] ss:$20 sps:$4 sm:$0xff]   ;;  %v4766_v63 = vld [vmem:[#allocation8 + $0x5a8] ss:$20 sps:$4 sm:$0xff]   ;;  %v4774_v42 = vld [vmem:[#allocation8 + $0x584] ss:$20 sps:$4 sm:$0xff]  }
 0x1c7   :  { %v4144_v54 = vpop.f32.mrf.mxu0  ;;  %3240 = vmatprep.subr.bf16.mxu0 %v4696_v50  ;;  %v4165_v4 = vpop.f32.mrf.mxu1  ;;  %v4771_v50 = vld [vmem:[#allocation8 + $0x2dc] ss:$20 sps:$4 sm:$0xff]   ;;  %v4769_v0 = vld [vmem:[#allocation8 + $0x2d8] ss:$20 sps:$4 sm:$0xff]  }
 0x1c8   :  { %v1741_v8 = vadd.f32 %v4164_v25, %v1701_v24  ;;  %v4780_v54 = vld [vmem:[#allocation8 + $0x55c] ss:$20 sps:$4 sm:$0xff]   ;;  %v4778_v4 = vld [vmem:[#allocation8 + $0x558] ss:$20 sps:$4 sm:$0xff]   ;;  %v4801_v24 = vld [vmem:[#allocation8 + $0x4c0] ss:$20 sps:$4 sm:$0xff]  }
 0x1c9   :  { %v4166_v5 = vpop.f32.mrf.mxu1  ;;  %v4796_v17 = vld [vmem:[#allocation8 + $0x4e8] ss:$20 sps:$4 sm:$0xff]   ;;  %v4793_v20 = vld [vmem:[#allocation8 + $0x4b8] ss:$20 sps:$4 sm:$0xff]   ;;  %v4798_v25 = vld [vmem:[#allocation8 + $0x490] ss:$20 sps:$4 sm:$0xff]  }
 0x1ca   :  { %3241 = vmatpush1.bf16.msra.mxu0 %v4694_v2  ;;  %v4777_v2 = vld [vmem:[#allocation8 + $0x2b4] ss:$20 sps:$4 sm:$0xff]   ;;  %v4783_v5 = vld [vmem:[#allocation8 + $0x28c] ss:$20 sps:$4 sm:$0xff]  }
 0x1cb   :  { %3242 = vmatprep.subr.bf16.mxu0 %v4702_v3  ;;  %v4775_v3 = vld [vmem:[#allocation8 + $0x2b0] ss:$20 sps:$4 sm:$0xff]  }
 0x1ce   :  { %3243 = vmatpush2.bf16.msra.mxu0 %v4700_v6  ;;  %v4786_v6 = vld [vmem:[#allocation8 + $0x534] ss:$20 sps:$4 sm:$0xff]  }
 0x1cf   :  { %3244 = vmatprep.subr.bf16.mxu0 %v4708_v7  ;;  %v4781_v7 = vld [vmem:[#allocation8 + $0x288] ss:$20 sps:$4 sm:$0xff]  }
 0x1d2   :  { %3245 = vmatpush2.bf16.msra.mxu0 %v4706_v9  ;;  %v4784_v9 = vld [vmem:[#allocation8 + $0x530] ss:$20 sps:$4 sm:$0xff]  }
 0x1d3   :  { %3246 = vmatprep.subr.bf16.mxu0 %v4714_v10  ;;  %v4789_v10 = vld [vmem:[#allocation8 + $0x4e4] ss:$20 sps:$4 sm:$0xff]  }
 0x1d6   :  { %3247 = vmatpush2.bf16.msra.mxu0 %v4712_v12  ;;  %v4792_v12 = vld [vmem:[#allocation8 + $0x50c] ss:$20 sps:$4 sm:$0xff]  }
 0x1d7   :  { %3248 = vmatprep.subr.bf16.mxu0 %v4720_v13  ;;  %v4787_v13 = vld [vmem:[#allocation8 + $0x4e0] ss:$20 sps:$4 sm:$0xff]  }
 0x1da   :  { %3249 = vmatpush2.bf16.msra.mxu0 %v4718_v15  ;;  %v4790_v15 = vld [vmem:[#allocation8 + $0x508] ss:$20 sps:$4 sm:$0xff]  }
 0x1db   :  { %3250 = vmatprep.subr.bf16.mxu0 %v4726_v16  ;;  %v4795_v16 = vld [vmem:[#allocation8 + $0x4bc] ss:$20 sps:$4 sm:$0xff]  }
 0x1de   :  { %3251 = vmatpush2.bf16.msra.mxu0 %v4724_v22  ;;  %v4797_v22 = vld [vmem:[#allocation8 + $0x3a8] ss:$20 sps:$4 sm:$0xff]  }
 0x1df   :  { %3252 = vmatprep.subr.bf16.mxu0 %v4732_v23  ;;  %v4800_v23 = vld [vmem:[#allocation8 + $0x494] ss:$20 sps:$4 sm:$0xff]  }
 0x1e1   :  { %v1780_v28 = vpop.f32.mrf.mxu0 }
 0x1e2   :  { %v1781_v29 = vadd.f32 %v1780_v28, %v1741_v8  ;;  %3253 = vmatpush2.bf16.msra.mxu0 %v4730_v26  ;;  %v4802_v26 = vld [vmem:[#allocation8 + $0x380] ss:$20 sps:$4 sm:$0xff]   ;;  %v4806_v8 = vld [vmem:[#allocation8 + $0x498] ss:$20 sps:$4 sm:$0xff]   ;;  %v4803_v28 = vld [vmem:[#allocation8 + $0x468] ss:$20 sps:$4 sm:$0xff]  }
 0x1e3   :  { %v4250_v11 = vpop.f32.mrf.mxu0  ;;  %3254 = vmatprep.subr.bf16.mxu0 %v4738_v27  ;;  %v4805_v27 = vld [vmem:[#allocation8 + $0x46c] ss:$20 sps:$4 sm:$0xff]  }
 0x1e4   :  { %v1790_v37 = vmax.f32 %v1781_v29, 0.0  ;;  %v4807_v29 = vld [vmem:[#allocation8 + $0x358] ss:$20 sps:$4 sm:$0xff]   ;;  %v4811_v11 = vld [vmem:[#allocation8 + $0x470] ss:$20 sps:$4 sm:$0xff]  }
 0x1e5   :  { %v1783_v32 = vpop.f32.mrf.mxu0 }
 0x1e6   :  { %v5147_v35 = vpack.c.bf16 %v1790_v37, %v1790_v37  ;;  %3255 = vmatpush2.bf16.msra.mxu0 %v4736_v30  ;;  %v4810_v30 = vld [vmem:[#allocation8 + $0x444] ss:$20 sps:$4 sm:$0xff]   ;;  %v4815_v32 = vld [vmem:[#allocation8 + $0x41c] ss:$20 sps:$4 sm:$0xff]  }
 0x1e7   :  { %v4251_v43 = vpop.f32.mrf.mxu0  ;;  %3256 = vmatprep.subr.bf16.mxu0 %v4744_v31  ;;  %v4808_v31 = vld [vmem:[#allocation8 + $0x440] ss:$20 sps:$4 sm:$0xff]   ;;  %v4812_v37 = vld [vmem:[#allocation8 + $0x330] ss:$20 sps:$4 sm:$0xff]  }
 0x1e8   :  { %3218 = vmatmul.mubr.bf16.vlgmr.msra.gmra.mxu1 %v5147_v35  ;;  %v4821_v43 = vld [vmem:[#allocation8 + $0x420] ss:$20 sps:$4 sm:$0xff]  }
 0x1e9   :  { %3268 = vmatpush1.bf16.msra.mxu1 %v4739_v34  ;;  %3299 = vmatprep.mubr.bf16.mxu1 %v5136_v41  ;;  %v4813_v34 = vld [vmem:[#allocation8 + $0x418] ss:$20 sps:$4 sm:$0xff]  }
 0x1ea   :  { %3257 = vmatpush2.bf16.msra.mxu0 %v4742_v39  ;;  %3269 = vmatprep.subr.bf16.mxu1 %v4747_v40  ;;  %v4817_v39 = vld [vmem:[#allocation8 + $0x308] ss:$20 sps:$4 sm:$0xff]  }
 0x1eb   :  { %3308 = vmatprep.subr.bf16.mxu0 %v4750_v45  ;;  %v4820_v40 = vld [vmem:[#allocation8 + $0x3f4] ss:$20 sps:$4 sm:$0xff]   ;;  %v4818_v45 = vld [vmem:[#allocation8 + $0x3f0] ss:$20 sps:$4 sm:$0xff]  }
 0x1ed   :  { %3259 = vmatmul.mubr.bf16.vlgmr.msra.gmra.mxu0 %v5123_v62  ;;  %3270 = vmatpush1.bf16.msra.mxu1 %v4745_v46  ;;  %v4822_v46 = vld [vmem:[#allocation8 + $0x2e0] ss:$20 sps:$4 sm:$0xff]  }
 0x1ee   :  { %3309 = vmatpush1.bf16.msra.mxu0 %v4748_v47  ;;  %3271 = vmatprep.subr.bf16.mxu1 %v4753_v48  ;;  %v4825_v47 = vld [vmem:[#allocation8 + $0x3cc] ss:$20 sps:$4 sm:$0xff]  }
 0x1ef   :  { %3310 = vmatprep.subr.bf16.mxu0 %v4756_v49  ;;  %3340 = vmatprep.mubr.bf16.mxu0 %v5000_v1  ;;  %v4772_v1 = vld [vmem:[#allocation8 + $0x580] ss:$20 sps:$4 sm:$0xff]   ;;  %v4826_v48 = vld [vmem:[#allocation8 + $0x3f8] ss:$20 sps:$4 sm:$0xff]   ;;  %v4823_v49 = vld [vmem:[#allocation8 + $0x3c8] ss:$20 sps:$4 sm:$0xff]  }
 0x1f1   :  { %3272 = vmatpush1.bf16.msra.mxu1 %v4751_v51  ;;  %v4827_v51 = vld [vmem:[#allocation8 + $0x2b8] ss:$20 sps:$4 sm:$0xff]  }
 0x1f2   :  { %3311 = vmatpush1.bf16.msra.mxu0 %v4754_v52  ;;  %3273 = vmatprep.subr.bf16.mxu1 %v4759_v53  ;;  %v4828_v52 = vld [vmem:[#allocation8 + $0x268] ss:$20 sps:$4 sm:$0xff]   ;;  %v4830_v53 = vld [vmem:[#allocation8 + $0x3d0] ss:$20 sps:$4 sm:$0xff]  }
 0x1f3   :  { %3312 = vmatprep.subr.bf16.mxu0 %v4762_v55  ;;  %v4829_v55 = vld [vmem:[#allocation8 + $0x128] ss:$20 sps:$4 sm:$0xff]  }
 0x1f5   :  { %3274 = vmatpush1.bf16.msra.mxu1 %v4757_v56  ;;  %v4831_v56 = vld [vmem:[#allocation8 + $0x290] ss:$20 sps:$4 sm:$0xff]  }
 0x1f6   :  { %3313 = vmatpush1.bf16.msra.mxu0 %v4760_v57  ;;  %3275 = vmatprep.subr.bf16.mxu1 %v4765_v58  ;;  %v4832_v57 = vld [vmem:[#allocation8 + $0x240] ss:$20 sps:$4 sm:$0xff]  }
 0x1f7   :  { %3314 = vmatprep.subr.bf16.mxu0 %v4768_v59  ;;  %v4833_v58 = vld [vmem:[#allocation8 + $0x100] ss:$20 sps:$4 sm:$0xff]   ;;  %v4834_v59 = vld [vmem:[#allocation8 + $0x218] ss:$20 sps:$4 sm:$0xff]  }
 0x1f9   :  { %3276 = vmatpush1.bf16.msra.mxu1 %v4763_v61 }
 0x1fa   :  { %3315 = vmatpush1.bf16.msra.mxu0 %v4766_v63  ;;  %3277 = vmatprep.subr.bf16.mxu1 %v4771_v50  ;;  %v4835_v50 = vld [vmem:[#allocation8 + $0xd8] ss:$20 sps:$4 sm:$0xff]  }
 0x1fb   :  { %3316 = vmatprep.subr.bf16.mxu0 %v4774_v42  ;;  %v4836_v42 = vld [vmem:[#allocation8 + $0x1f0] ss:$20 sps:$4 sm:$0xff]  }
 0x1fd   :  { %3278 = vmatpush1.bf16.msra.mxu1 %v4769_v0 }
 0x1fe   :  { %3317 = vmatpush1.bf16.msra.mxu0 %v4772_v1  ;;  %3279 = vmatprep.subr.bf16.mxu1 %v4777_v2  ;;  %v4837_v2 = vld [vmem:[#allocation8 + $0xb0] ss:$20 sps:$4 sm:$0xff]  }
 0x1ff   :  { %3318 = vmatprep.subr.bf16.mxu0 %v4780_v54  ;;  %v4838_v54 = vld [vmem:[#allocation8 + $0x1c8] ss:$20 sps:$4 sm:$0xff]  }
 0x201   :  { %3280 = vmatpush1.bf16.msra.mxu1 %v4775_v3  ;;  %v4840_v3 = vld [vmem:[#allocation8 + $0x1a0] ss:$20 sps:$4 sm:$0xff]  }
 0x202   :  { %3319 = vmatpush1.bf16.msra.mxu0 %v4778_v4  ;;  %3281 = vmatprep.subr.bf16.mxu1 %v4783_v5  ;;  %v4841_v4 = vld [vmem:[#allocation8 + $0x60] ss:$20 sps:$4 sm:$0xff]   ;;  %v4842_v5 = vld [vmem:[#allocation8 + $0x178] ss:$20 sps:$4 sm:$0xff]  }
 0x203   :  { %3320 = vmatprep.subr.bf16.mxu0 %v4786_v6  ;;  %v4844_v6 = vld [vmem:[#allocation8 + $0x150] ss:$20 sps:$4 sm:$0xff]  }
 0x205   :  { %3282 = vmatpush1.bf16.msra.mxu1 %v4781_v7  ;;  %v4845_v7 = vld [vmem:[#allocation8 + $0x10] ss:$20 sps:$4 sm:$0xff]  }
 0x206   :  { %3321 = vmatpush1.bf16.msra.mxu0 %v4784_v9  ;;  %3283 = vmatprep.subr.bf16.mxu1 %v4789_v10  ;;  %v4846_v9 = vld [vmem:[#allocation8 + $0x628] ss:$20 sps:$4 sm:$0xff]   ;;  %v4847_v10 = vld [vmem:[#allocation8 + $0x600] ss:$20 sps:$4 sm:$0xff]  }
 0x207   :  { %3322 = vmatprep.subr.bf16.mxu0 %v4792_v12  ;;  %v4848_v12 = vld [vmem:[#allocation8 + $0x5d8] ss:$20 sps:$4 sm:$0xff]  }
 0x209   :  { %3284 = vmatpush2.bf16.msra.mxu1 %v4787_v13  ;;  %v4849_v13 = vld [vmem:[#allocation8 + $0x5b0] ss:$20 sps:$4 sm:$0xff]  }
 0x20a   :  { %3323 = vmatpush1.bf16.msra.mxu0 %v4790_v15  ;;  %3285 = vmatprep.subr.bf16.mxu1 %v4795_v16  ;;  %v4850_v15 = vld [vmem:[#allocation8 + $0x588] ss:$20 sps:$4 sm:$0xff]   ;;  %v4852_v16 = vld [vmem:[#allocation8 + $0x538] ss:$20 sps:$4 sm:$0xff]  }
 0x20b   :  { %4199 = vmatprep.subr.bf16.mxu0 %v4796_v17  ;;  %v4853_v17 = vld [vmem:[#allocation8 + $0x510] ss:$20 sps:$4 sm:$0xff]  }
 0x20d   :  { %3286 = vmatpush2.bf16.msra.mxu1 %v4793_v20  ;;  %3341 = vmatmul.mubr.bf16.vlgmr.msra.gmra.mxu0 %v5147_v35 }
 0x20e   :  { %4200 = vmatpush3.bf16.msra.mxu0 %v4797_v22  ;;  %3421 = vmatprep.mubr.bf16.mxu0 %v5136_v41  ;;  %v4816_v41 = vld [vmem:[#allocation8 + $0x448] ss:$20 sps:$4 sm:$0xff]  }
 0x20f   :  { %3287 = vmatprep.subr.bf16.mxu1 %v4800_v23  ;;  %4201 = vmatprep.subr.bf16.mxu0 %v4801_v24 }
 0x211   :  { %3288 = vmatpush2.bf16.msra.mxu1 %v4798_v25  ;;  %v5172_v25 = vld [vmem:[#allocation9] sm:$0x1f] }
 0x212   :  { %4202 = vmatpush3.bf16.msra.mxu0 %v4802_v26  ;;  %3289 = vmatprep.subr.bf16.mxu1 %v4805_v27  ;;  %v2041_v26 = vrot.slane %v5172_v25, %v5108_v36  ;;  %v2045_v27 = vrot.slane %v5172_v25, %v343_v38 }
 0x213   :  { %4203 = vmatprep.subr.bf16.mxu0 %v4806_v8 }
 0x215   :  { %3290 = vmatpush2.bf16.msra.mxu1 %v4803_v28 }
 0x216   :  { %4204 = vmatpush3.bf16.msra.mxu0 %v4807_v29  ;;  %3291 = vmatprep.subr.bf16.mxu1 %v4810_v30 }
 0x217   :  { %4205 = vmatprep.subr.bf16.mxu0 %v4811_v11 }
 0x219   :  { %3292 = vmatpush2.bf16.msra.mxu1 %v4808_v31 }
 0x21a   :  { %4206 = vmatpush3.bf16.msra.mxu0 %v4812_v37  ;;  %3293 = vmatprep.subr.bf16.mxu1 %v4815_v32 }
 0x21b   :  { %4207 = vmatprep.subr.bf16.mxu0 %v4816_v41 }
 0x21d   :  { %3294 = vmatpush2.bf16.msra.mxu1 %v4813_v34 }
 0x21e   :  { %4208 = vmatpush3.bf16.msra.mxu0 %v4817_v39  ;;  %3295 = vmatprep.subr.bf16.mxu1 %v4820_v40  ;;  %v3475_v39 = vld [vmem:[#allocation11 + $0x8] sm:$0xff]  ;;  %v3477_v40 = vld [vmem:[#allocation11 + $0x18] sm:$0xff] }
 0x21f   :  { %4209 = vmatprep.subr.bf16.mxu0 %v4821_v43 }
 0x221   :  { %3296 = vmatpush2.bf16.msra.mxu1 %v4818_v45 }
 0x222   :  { %4210 = vmatpush3.bf16.msra.mxu0 %v4822_v46  ;;  %3297 = vmatprep.subr.bf16.mxu1 %v4825_v47 }
 0x223   :  { %4211 = vmatprep.subr.bf16.mxu0 %v4826_v48  ;;  %v3474_v48 = vld [vmem:[#allocation11] sm:$0xff] }
 0x225   :  { %3298 = vmatpush2.bf16.msra.mxu1 %v4823_v49  ;;  %v3689_v49 = vld [vmem:[#allocation2] sm:$0x1] }
 0x226   :  { %4212 = vmatpush3.bf16.msra.mxu0 %v4827_v51  ;;  %4177 = vmatprep.subr.bf16.mxu1 %v4828_v52 }
 0x227   :  { %4213 = vmatprep.subr.bf16.mxu0 %v4830_v53  ;;  %3692 = vperm.xlu0 %4288, %v3689_v49  }
 0x228   :  { %3300 = vmatmul.mubr.bf16.vlgmr.msra.gmra.mxu1 %v5138_v44 }
 0x229   :  { %4178 = vmatpush3.bf16.msra.mxu1 %v4829_v55  ;;  %3381 = vmatprep.mubr.bf16.mxu1 %v5121_v60  ;;  %v4839_v60 = vld [vmem:[#allocation8 + $0x88] ss:$20 sps:$4 sm:$0xff]  }
 0x22a   :  { %4214 = vmatpush3.bf16.msra.mxu0 %v4831_v56  ;;  %4179 = vmatprep.subr.bf16.mxu1 %v4832_v57  ;;  %v2049_v56 = vrot.slane %v5172_v25, %v347_v18  ;;  %v2053_v57 = vrot.slane %v5172_v25, %v351_v19  ;;  %v3476_v19 = vld [vmem:[#allocation11 + $0x10] sm:$0xff] }
 0x22b   :  { %v5157_v61 = vpop.f32.mrf.mxu1 }
 0x22c   :  { %v3138_v8 = vadd.f32 %v5157_v61, %v2041_v26  ;;  %v3478_v26 = vld [vmem:[#allocation11 + $0x20] sm:$0xff] }
 0x22d   :  { %4180 = vmatpush3.bf16.msra.mxu1 %v4833_v58  ;;  %3422 = vmatmul.mubr.bf16.vlgmr.msra.gmra.mxu0 %v5138_v44  ;;  %v3139_v63 = vpop.f32.mrf.mxu1  ;;  %v4843_v44 = vld [vmem:[#allocation8 + $0x38] ss:$20 sps:$4 sm:$0xff]  }
 0x22e   :  { %4181 = vmatprep.subr.bf16.mxu1 %v4834_v59  ;;  %v3140_v28 = vadd.f32 %v3139_v63, %v2045_v27  ;;  %3543 = vmatprep.mubr.f32.mxu0 %v3475_v39 }
 0x22f   :  { %v3141_v0 = vpop.f32.mrf.mxu1 }
 0x231   :  { %4182 = vmatpush3.bf16.msra.mxu1 %v4835_v50  ;;  %v3142_v1 = vpop.f32.mrf.mxu1 }
 0x232   :  { %4183 = vmatprep.subr.bf16.mxu1 %v4836_v42 }
 0x235   :  { %4184 = vmatpush3.bf16.msra.mxu1 %v4837_v2 }
 0x236   :  { %4185 = vmatprep.subr.bf16.mxu1 %v4838_v54 }
 0x239   :  { %4186 = vmatpush3.bf16.msra.mxu1 %v4839_v60 }
 0x23a   :  { %4187 = vmatprep.subr.bf16.mxu1 %v4840_v3 }
 0x23d   :  { %4188 = vmatpush3.bf16.msra.mxu1 %v4841_v4 }
 0x23e   :  { %4189 = vmatprep.subr.bf16.mxu1 %v4842_v5 }
 0x241   :  { %4190 = vmatpush3.bf16.msra.mxu1 %v4843_v44 }
 0x242   :  { %4191 = vmatprep.subr.bf16.mxu1 %v4844_v6 }
 0x245   :  { %4192 = vmatpush3.bf16.msra.mxu1 %v4845_v7 }
 0x246   :  { %4252 = vmatprep.subr.bf16.mxu1 %v5001_v21 }
 0x248   :  { %3382 = vmatmul.mubr.bf16.vlgmr.msra.gmra.mxu1 %v5123_v62  ;;  %v4851_v62 = vld [vmem:[#allocation8 + $0x560] ss:$20 sps:$4 sm:$0xff]  }
 0x249   :  { %4253 = vmatpush3.bf16.msra.mxu1 %v4846_v9  ;;  %4268 = vmatprep.mubr.msk.bf16.mxu1 %vm5002_vm0, %v5001_v21 }
 0x24a   :  { %4254 = vmatprep.subr.bf16.mxu1 %v5001_v21 }
 0x24d   :  { %4255 = vmatpush3.bf16.msra.mxu1 %v4847_v10  ;;  %v2057_v10 = vrot.slane %v5172_v25, %v355_v14 }
 0x24e   :  { %4256 = vmatprep.subr.bf16.mxu1 %v5001_v21 }
 0x251   :  { %4257 = vmatpush3.bf16.msra.mxu1 %v4848_v12 }
 0x252   :  { %4258 = vmatprep.subr.bf16.mxu1 %v5001_v21 }
 0x255   :  { %4259 = vmatpush3.bf16.msra.mxu1 %v4849_v13 }
 0x256   :  { %4260 = vmatprep.subr.bf16.mxu1 %v5001_v21 }
 0x259   :  { %4261 = vmatpush3.bf16.msra.mxu1 %v4850_v15 }
 0x25a   :  { %4262 = vmatprep.subr.bf16.mxu1 %v5001_v21 }
 0x25d   :  { %4263 = vmatpush3.bf16.msra.mxu1 %v4851_v62 }
 0x25e   :  { %4264 = vmatprep.subr.bf16.mxu1 %v5001_v21 }
 0x261   :  { %4265 = vmatpush3.bf16.msra.mxu1 %v4852_v16 }
 0x262   :  { %4266 = vmatprep.subr.bf16.mxu1 %v5001_v21 }
 0x265   :  { %4267 = vmatpush3.bf16.msra.mxu1 %v4853_v17 }
 0x268   :  { %4269 = vmatmul.mubr.bf16.vlgmr.msra.gmra.mxu1 %v5147_v35 }
 0x269   :  { %3613 = vmatprep.mubr.f32.mxu1 %v3477_v40 }
 0x26d   :  { %v3178_v20 = vpop.f32.mrf.mxu0 }
 0x26e   :  { %v3179_v29 = vadd.f32 %v3178_v20, %v3138_v8 }
 0x26f   :  { %v3180_v22 = vpop.f32.mrf.mxu0 }
 0x270   :  { %v3181_v11 = vadd.f32 %v3180_v22, %v3140_v28 }
 0x271   :  { %v3182_v23 = vpop.f32.mrf.mxu0 }
 0x273   :  { %v3183_v24 = vpop.f32.mrf.mxu0 }
 0x2a8   :  { %v3219_v30 = vpop.f32.mrf.mxu1 }
 0x2a9   :  { %v3220_v35 = vadd.f32 %v3219_v30, %v3179_v29  ;;  %v3693_v29 = vpop.permute.xlu0 %3692 }
 0x2aa   :  { %v3221_v31 = vpop.f32.mrf.mxu1  ;;  %v3698_v25 = vrot.slane %v3693_v29, %v5108_v36 }
 0x2ab   :  { %v3222_v37 = vadd.f32 %v3221_v31, %v3181_v11 }
 0x2ac   :  { %v3223_v32 = vpop.f32.mrf.mxu1 }
 0x2ad   :  { %4854 = vtanh.f32 %v3222_v37  ;;  %v3260_v41 = vpop.f32.mrf.mxu0 }
 0x2ae   :  { %4856 = vtanh.f32 %v3220_v35  ;;  %v3224_v34 = vpop.f32.mrf.mxu1  ;;  %v3261_v58 = vadd.f32 %v3260_v41, %v2049_v56 }
 0x2af   :  { %v3262_v43 = vpop.f32.mrf.mxu0 }
 0x2b0   :  { %v3263_v61 = vadd.f32 %v3262_v43, %v2053_v57 }
 0x2b1   :  { %v3264_v38 = vpop.f32.mrf.mxu0 }
 0x2b3   :  { %v3265_v45 = vpop.f32.mrf.mxu0 }
 0x2ba   :  { %v4855_v46 = vpop.eup %4854 }
 0x2bb   :  { %v4857_v47 = vpop.eup %4856  ;;  %3509 = vmatprep.subr.mxu0 %v4855_v46 }
 0x2bc   :  { %3510 = vmatpush1.xpose.msra.mxu0 %v4857_v47 }
 0x2bd   :  { %4272 = vmatprep.subr.mxu0 %v5001_v21 }
 0x2bf   :  { %3544 = vmatmul.mubr.f32.vlgmr.msra.gmra.mxu0 %v3474_v48 }
 0x2c0   :  { %4274 = vmatprep.mubr.msk.f32.mxu0 %vm5002_vm0, %v5001_v21 }
 0x2cd   :  { %v3342_v51 = vpop.f32.mrf.mxu0 }
 0x2cf   :  { %v3344_v52 = vpop.f32.mrf.mxu0 }
 0x2d1   :  { %v3346_v53 = vpop.f32.mrf.mxu0 }
 0x2d3   :  { %v3347_v55 = vpop.f32.mrf.mxu0 }
 0x2e8   :  { %v3301_v59 = vpop.f32.mrf.mxu1 }
 0x2e9   :  { %v3302_v63 = vadd.f32 %v3301_v59, %v3261_v58 }
 0x2ea   :  { %v3303_v50 = vpop.f32.mrf.mxu1 }
 0x2eb   :  { %v3304_v42 = vadd.f32 %v3303_v50, %v3263_v61  ;;  %v3343_v0 = vadd.f32 %v3342_v51, %v3302_v63 }
 0x2ec   :  { %v3305_v21 = vpop.f32.mrf.mxu1 }
 0x2ed   :  { %v3345_v1 = vadd.f32 %v3344_v52, %v3304_v42  ;;  %v4215_v2 = vpop.f32.mrf.mxu0 }
 0x2ee   :  { %v3306_v54 = vpop.f32.mrf.mxu1 }
 0x2ef   :  { %4858 = vtanh.f32 %v3345_v1  ;;  %v4216_v60 = vpop.f32.mrf.mxu0 }
 0x2f0   :  { %4860 = vtanh.f32 %v3343_v0  ;;  %v4217_v15 = vadd.f32 %v4216_v60, %v4215_v2 }
 0x2f1   :  { %v4218_v3 = vpop.f32.mrf.mxu0 }
 0x2f3   :  { %v4219_v18 = vpop.f32.mrf.mxu0 }
 0x2fc   :  { %v4859_v4 = vpop.eup %4858 }
 0x2fd   :  { %v4861_v5 = vpop.eup %4860  ;;  %3579 = vmatprep.subr.mxu1 %v4859_v4 }
 0x2fe   :  { %3580 = vmatpush1.xpose.msra.mxu1 %v4861_v5 }
 0x301   :  { %3614 = vmatmul.mubr.f32.vlgmr.msra.gmra.mxu1 %v3476_v19 }
 0x308   :  { %v4193_v44 = vpop.f32.mrf.mxu1 }
 0x30a   :  { %v4194_v6 = vpop.f32.mrf.mxu1 }
 0x30b   :  { %v4195_v12 = vadd.f32 %v4194_v6, %v4193_v44 }
 0x30c   :  { %v4196_v7 = vpop.f32.mrf.mxu1 }
 0x30d   :  { %v3384_v13 = vadd.f32 %v4195_v12, %v2057_v10 }
 0x30e   :  { %v4197_v9 = vpop.f32.mrf.mxu1 }
 0x30f   :  { %v3424_v62 = vadd.f32 %v4217_v15, %v3384_v13 }
 0x328   :  { %v3463_v16 = vpop.f32.mrf.mxu1 }
 0x329   :  { %v3464_v17 = vadd.f32 %v3463_v16, %v3424_v62 }
 0x32a   :  { %v4270_v20 = vpop.f32.mrf.mxu1 }
 0x32b   :  { %4862 = vtanh.f32 %v3464_v17 }
 0x32c   :  { %v3466_v22 = vpop.f32.mrf.mxu1 }
 0x32e   :  { %v4271_v23 = vpop.f32.mrf.mxu1 }
 0x338   :  { %v4863_v24 = vpop.eup %4862 }
 0x339   :  { %4273 = vmatpush3.xpose.msra.mxu0 %v4863_v24 }
 0x33c   :  { %4275 = vmatmul.mubr.f32.vlgmr.msra.gmra.mxu0 %v3478_v26 }
 0x37f   :  { %v3545_v27 = vpop.f32.mrf.mxu0 }
 0x381   :  { %v3547_v8 = vpop.f32.mrf.mxu0 }
 0x3c1   :  { %v3615_v28 = vpop.f32.mrf.mxu1 }
 0x3c2   :  { %v3616_v14 = vadd.f32 %v3615_v28, %v3545_v27 }
 0x3c3   :  { %v3617_v33 = vpop.f32.mrf.mxu1 }
 0x3fc   :  { %v3685_v30 = vpop.f32.mrf.mxu0 }
 0x3fd   :  { %v3686_v11 = vadd.f32 %v3685_v30, %v3616_v14 }
 0x3fe   :  { %v4276_v35 = vpop.f32.mrf.mxu0 }
 0x3ff   :  { %v3699_v31 = vadd.f32 %v3698_v25, %v3686_v11 }
 0x401   :  { %3701 = vst.msk [vmem:[#allocation12] sm:$0x1] %vm3700_vm1, %v3699_v31 }
 0x402   :  { %4976 = shalt.err (!%p4973_p1)
}
 0x403   :  { %3711 = dma.vmem_to_hbm [thread:$0]  %s3709_s27, 16, %s5203_s7, [#allocation5]  }
 0x404   :  { %4991 = dma.done.wait [#allocation5], 16  }
 0x405   :  { %4992 = vsyncadd [#allocation5], 4294967280 }
 0x406   :  { %3715 = vsyncpa [#allocation4], 1 }
 0x407   :  { %3716 = vsyncpa [#allocation7], 1 }
 0x408   :  { %3717 = vsyncpa [#allocation10], 1 }
 0x409   :  { %3718 = vsyncpa [#allocation5], 1 }

</bundles_post_ra>
